<compile_context>
chip_gen: v5e
topology: v5e:2x2
jax: 0.10.0
libtpu: 0.0.40
codegen_flags: <defaults>
</compile_context>

<pallas_src>
import numpy as np
import jax
import jax.numpy as jnp
from jax.experimental import pallas as pl
from jax.experimental.pallas import tpu as pltpu

HID = 768        # module hard-codes hid_size = 768
LANE = 128       # TPU lane width: label (cur-tag) axis is padded to this
NEG = -1.0e30    # "minus infinity" fill for padded label slots


# ------------------- fused linear + Viterbi + backtracking -------------------

def bert_crf_kernel(mask_ref, ends_ref, x_ref, w_ref, bias_ref, trans_ref,
                    start_ref, end_ref, tags_ref, emis_sc, bp_sc):
    b = pl.program_id(0)
    T = x_ref.shape[1]
    SUB, LP = trans_ref.shape          # prev-tag sublanes (ceil(L/8)*8), 128 lanes
    unrolled = T <= 32

    # ---- Linear: emissions = x @ W + b.  x read from HBM as f32 and cast to
    # bf16 in VMEM; bf16 x bf16 -> f32 on the MXU.  Emissions stay in scratch.
    x = x_ref[0].astype(jnp.bfloat16)                              # (T, HID)
    emis_sc[...] = (jnp.dot(x, w_ref[...],
                            preferred_element_type=jnp.float32)
                    + bias_ref[...])                               # (T, LP) f32

    trans = trans_ref[...]                                         # (SUB, LP)
    prev_iota = jax.lax.broadcasted_iota(jnp.int32, (SUB, LP), 0)  # [p,c] = p
    lane_iota = jax.lax.broadcasted_iota(jnp.int32, (SUB, LP), 1)  # [p,c] = c
    eye = lane_iota == prev_iota                                   # [p,c] = (c == p)
    lane_row = jax.lax.broadcasted_iota(jnp.int32, (1, LP), 1)

    # t = 0: start scores + first emission (row over cur tags along lanes).
    score = start_ref[...] + emis_sc[pl.ds(0, 1), :]               # (1, LP)
    # Row 0 of the backpointers is only read when T == 1 (and then ignored);
    # zero it for determinism.
    bp_sc[pl.ds(0, 1), :] = jnp.zeros((1, LP), jnp.int32)

    def step(t, score):
        # Scalar mask read first: keeps the SMEM path off the vector chain.
        valid = mask_ref[b * T + t] > 0
        # prev-tag scores as a (SUB, 1) column: lane p -> sublane p (1-vreg
        # select + lane reduce on the XLU).
        prev_col = jnp.max(
            jnp.where(eye, jnp.broadcast_to(score, (SUB, LP)), NEG),
            axis=1, keepdims=True)                                  # (SUB, 1)
        full = prev_col + trans                                     # (SUB, LP)
        maxv = jnp.max(full, axis=0, keepdims=True)                 # (1, LP)
        # First-index argmax over the previous tag (torch.max / np.argmax).
        idx = jnp.min(jnp.where(full == maxv, prev_iota, SUB),
                      axis=0, keepdims=True).astype(jnp.int32)      # (1, LP)
        bp_sc[pl.ds(t, 1), :] = idx
        # Emission is constant over prev, so it can be added after the max
        # (does not change the argmax).
        nxt = maxv + emis_sc[pl.ds(t, 1), :]
        return jnp.where(valid, nxt, score)

    if unrolled:
        for t in range(1, T):
            score = step(t, score)
    else:
        score = jax.lax.fori_loop(1, T, step, score, unroll=8)

    # ---- backtracking (in-kernel: no backpointer HBM writeback, no XLA scan)
    final = score + end_ref[...]                                    # (1, LP)
    fmax = jnp.max(final, axis=1, keepdims=True)
    best_last = jnp.min(jnp.where(final == fmax, lane_row, LP),
                        axis=1, keepdims=True).astype(jnp.int32)    # (1, 1)
    seq_end = ends_ref[b]                                           # scalar int32
    t_iota = jax.lax.broadcasted_iota(jnp.int32, (1, T), 1)

    def back_step(k, carry):
        cur, tags = carry                                           # (1,1), (1,T)
        t = T - 1 - k
        nxt_t = jnp.minimum(t + 1, T - 1)
        bp_row = bp_sc[pl.ds(nxt_t, 1), :]                          # (1, LP)
        # lane-gather bp_row[cur] (exactly one lane matches, values >= 0)
        from_bp = jnp.sum(jnp.where(lane_row == cur, bp_row, 0),
                          axis=1, keepdims=True)                    # (1, 1)
        tag_t = jnp.where(t == seq_end, best_last,
                          jnp.where(t < seq_end, from_bp,
                                    jnp.zeros_like(from_bp)))
        tags = jnp.where(t_iota == t, tag_t, tags)
        return tag_t, tags

    carry = (jnp.zeros((1, 1), jnp.int32), jnp.zeros((1, T), jnp.int32))
    if unrolled:
        for k in range(T):
            carry = back_step(k, carry)
    else:
        carry = jax.lax.fori_loop(0, T, back_step, carry, unroll=8)

    tags_ref[...] = carry[1].reshape(1, 1, T)


# ----------------------------- parameter padding -----------------------------

def pad_crf_params(w, b, start, end, trans):
    """Lane-pad the cur-tag axis to 128, sublane-pad prev-tag axis to ceil(L/8)*8.

    Padded slots get NEG (transitions / start / end) or 0 (weights / bias), so
    phantom tags can never win the Viterbi argmax."""
    L = w.shape[1]
    assert L <= LANE, "num_labels > 128 not supported by this kernel"
    SUB = max(8, ((L + 7) // 8) * 8)
    w_p = jnp.zeros((HID, LANE), jnp.float32).at[:, :L].set(w)
    b_p = jnp.zeros((1, LANE), jnp.float32).at[:, :L].set(b.reshape(1, L))
    start_p = jnp.full((1, LANE), NEG, jnp.float32).at[:, :L].set(
        start.reshape(1, L))
    end_p = jnp.full((1, LANE), NEG, jnp.float32).at[:, :L].set(
        end.reshape(1, L))
    trans_p = jnp.full((SUB, LANE), NEG, jnp.float32).at[:L, :L].set(trans)
    return w_p, b_p, start_p, end_p, trans_p


# ------------------------------- model forward --------------------------------

def bert_crf_decode(params, length, word2vec, mask):
    # `length` is accepted (like the torch module) but decode uses `mask`.
    del length
    B, T, H = word2vec.shape
    assert H == HID

    w_p, b_p, start_p, end_p, trans_p = pad_crf_params(
        params["w"], params["b"], params["start"], params["end"],
        params["transitions"])
    SUB = trans_p.shape[0]

    # dropout -> identity at inference
    mask = mask.astype(jnp.int32)
    seq_ends = (jnp.sum(mask, axis=1) - 1).astype(jnp.int32)        # (B,)

    tags = pl.pallas_call(
        bert_crf_kernel,
        out_shape=jax.ShapeDtypeStruct((B, 1, T), jnp.int32),
        grid_spec=pltpu.PrefetchScalarGridSpec(
            num_scalar_prefetch=2,                 # flat mask + seq_ends -> SMEM
            grid=(B,),
            in_specs=[
                pl.BlockSpec((1, T, HID), lambda b, m, se: (b, 0, 0)),   # word2vec
                pl.BlockSpec((HID, LANE), lambda b, m, se: (0, 0)),      # W (bf16)
                pl.BlockSpec((1, LANE), lambda b, m, se: (0, 0)),        # bias
                pl.BlockSpec((SUB, LANE), lambda b, m, se: (0, 0)),      # transitions
                pl.BlockSpec((1, LANE), lambda b, m, se: (0, 0)),        # start
                pl.BlockSpec((1, LANE), lambda b, m, se: (0, 0)),        # end
            ],
            out_specs=pl.BlockSpec((1, 1, T), lambda b, m, se: (b, 0, 0)),
            scratch_shapes=[
                pltpu.VMEM((T, LANE), jnp.float32),   # emissions (never hit HBM)
                pltpu.VMEM((T, LANE), jnp.int32),     # backpointers (never hit HBM)
            ]),
        compiler_params=pltpu.CompilerParams(
            # batches are independent; on v7x pltpu.CORE_PARALLEL would force
            # sharding across both TensorCores, "parallel" stays portable.
            dimension_semantics=("parallel",),
            vmem_limit_bytes=32 * 1024 * 1024),
    )(mask.reshape(-1), seq_ends, word2vec,
      w_p.astype(jnp.bfloat16), b_p, trans_p, start_p, end_p)
    return tags[:, 0, :]                                             # (B, T)


# --------------------- numpy references (torchcrf.decode) ---------------------

def ref_decode(emissions, mask, start, end, trans):
    B, T, L = emissions.shape
    results = []
    for b in range(B):
        length = int(mask[b].sum())
        score = start + emissions[b, 0]
        history = []
        for t in range(1, T):
            nxt = score[:, None] + trans + emissions[b, t][None, :]
            history.append(nxt.argmax(axis=0))
            if mask[b, t]:
                score = nxt.max(axis=0)
        score = score + end
        best = int(score.argmax())
        tags = [best]
        for hist in reversed(history[:length - 1]):
            best = int(hist[tags[-1]])
            tags.append(best)
        tags.reverse()
        results.append(tags)
    return results


def path_score(em, start, end, trans, tags):
    s = start[tags[0]] + em[0, tags[0]]
    for i in range(1, len(tags)):
        s += trans[tags[i - 1], tags[i]] + em[i, tags[i]]
    return float(s + end[tags[-1]])


if __name__ == "__main__":
    B, T, L = 2, 8, 8          # batch, seq, num_labels
    key = jax.random.PRNGKey(0)
    k1, k2, k3, k4, k5, k6 = jax.random.split(key, 6)

    bound = 1.0 / np.sqrt(HID)  # nn.Linear default init range
    params = {
        "w": jax.random.uniform(k1, (HID, L), jnp.float32, -bound, bound),
        "b": jax.random.uniform(k2, (1, L), jnp.float32, -bound, bound),
        # torchcrf init: uniform(-0.1, 0.1)
        "start": jax.random.uniform(k3, (1, L), jnp.float32, -0.1, 0.1),
        "end": jax.random.uniform(k4, (1, L), jnp.float32, -0.1, 0.1),
        "transitions": jax.random.uniform(k5, (L, L), jnp.float32, -0.1, 0.1),
    }

    word2vec = jax.random.normal(k6, (B, T, HID), jnp.float32)
    lengths = jnp.array([T, 5], jnp.int32)
    mask = (jnp.arange(T)[None, :] < lengths[:, None]).astype(jnp.int32)

    tags = bert_crf_decode(params, lengths, word2vec, mask)
    tags = jax.block_until_ready(tags)
    tags_np = np.asarray(tags)

    # --- correctness check against a plain numpy reference ---
    # The kernel computes emissions in bf16 x bf16 -> f32 on the MXU, so the
    # reference uses the same bf16-rounded operands (f32 accumulation order may
    # still differ by ~1e-6; near-exact-tie paths fall back to a score check).
    x_bf = np.asarray(
        word2vec.astype(jnp.bfloat16).astype(jnp.float32)).reshape(B * T, HID)
    w_bf = np.asarray(params["w"].astype(jnp.bfloat16).astype(jnp.float32))
    em_ref = (x_bf @ w_bf + np.asarray(params["b"])).reshape(B, T, L)

    start_np = np.asarray(params["start"])[0]
    end_np = np.asarray(params["end"])[0]
    trans_np = np.asarray(params["transitions"])
    ref_tags = ref_decode(em_ref, np.asarray(mask), start_np, end_np, trans_np)

    for bi in range(B):
        ln = int(lengths[bi])
        kt = [int(v) for v in tags_np[bi, :ln]]
        rt = ref_tags[bi]
        assert len(rt) == ln
        assert all(0 <= v < L for v in kt), kt
        if kt != rt:
            # allow equal-score alternate optimum (MXU vs numpy accumulation order)
            ks = path_score(em_ref[bi], start_np, end_np, trans_np, kt)
            rs = path_score(em_ref[bi], start_np, end_np, trans_np, rt)
            assert abs(ks - rs) < 5e-4, (bi, kt, rt, ks, rs)

    print("KERNEL_OK")
</pallas_src>

<mosaic_0001>
module attributes {stable_mosaic.version = 11 : i64} {
  func.func @bert_crf_kernel(%arg0: i32, %arg1: memref<16xi32, #tpu.memory_space<smem>>, %arg2: memref<2xi32, #tpu.memory_space<smem>>, %arg3: memref<1x8x768xf32, #tpu.memory_space<vmem>>, %arg4: memref<768x128xbf16, #tpu.memory_space<vmem>>, %arg5: memref<1x128xf32, #tpu.memory_space<vmem>>, %arg6: memref<8x128xf32, #tpu.memory_space<vmem>>, %arg7: memref<1x128xf32, #tpu.memory_space<vmem>>, %arg8: memref<1x128xf32, #tpu.memory_space<vmem>>, %arg9: memref<1x1x8xi32, #tpu.memory_space<vmem>>, %arg10: memref<8x128xf32, #tpu.memory_space<vmem>>, %arg11: memref<8x128xi32, #tpu.memory_space<vmem>>) attributes {dimension_semantics = [#tpu.dimension_semantics<parallel>], iteration_bounds = array<i64: 2>, scalar_prefetch = 2 : i64, scratch_operands = 2 : i64, tpu.core_type = #tpu.core_type<tc>, window_params = [{transform_indices = @transform_0, window_bounds = array<i64: 1, 8, 768>}, {pipeline_mode = #tpu.pipeline_mode<synchronous>, transform_indices = @transform_1, window_bounds = array<i64: 768, 128>}, {pipeline_mode = #tpu.pipeline_mode<synchronous>, transform_indices = @transform_2, window_bounds = array<i64: 1, 128>}, {pipeline_mode = #tpu.pipeline_mode<synchronous>, transform_indices = @transform_3, window_bounds = array<i64: 8, 128>}, {pipeline_mode = #tpu.pipeline_mode<synchronous>, transform_indices = @transform_4, window_bounds = array<i64: 1, 128>}, {pipeline_mode = #tpu.pipeline_mode<synchronous>, transform_indices = @transform_5, window_bounds = array<i64: 1, 128>}, {transform_indices = @transform_6, window_bounds = array<i64: 1, 1, 8>}]} {
    %c0 = arith.constant 0 : index
    %c0_0 = arith.constant 0 : index
    %c0_1 = arith.constant 0 : index
    %0 = vector.load %arg3[%c0, %c0_0, %c0_1] : memref<1x8x768xf32, #tpu.memory_space<vmem>>, vector<1x8x768xf32>
    %1 = vector.shape_cast %0 : vector<1x8x768xf32> to vector<8x768xf32>
    %2 = arith.truncf %1 : vector<8x768xf32> to vector<8x768xbf16>
    %c0_2 = arith.constant 0 : index
    %c0_3 = arith.constant 0 : index
    %3 = vector.load %arg4[%c0_2, %c0_3] : memref<768x128xbf16, #tpu.memory_space<vmem>>, vector<768x128xbf16>
    %cst = arith.constant dense<0.000000e+00> : vector<8x128xf32>
    %4 = tpu.matmul %2, %3, %cst {dimension_numbers = #tpu.dot_dimension_numbers<[1], [0], [0], [1], [0, 0, 1, 1], [], []>} : vector<8x768xbf16>, vector<768x128xbf16>, vector<8x128xf32> -> vector<8x128xf32>
    %c0_4 = arith.constant 0 : index
    %c0_5 = arith.constant 0 : index
    %5 = vector.load %arg5[%c0_4, %c0_5] : memref<1x128xf32, #tpu.memory_space<vmem>>, vector<1x128xf32>
    %6 = vector.broadcast %5 : vector<1x128xf32> to vector<8x128xf32>
    %7 = arith.addf %4, %6 : vector<8x128xf32>
    %c0_6 = arith.constant 0 : index
    %c0_7 = arith.constant 0 : index
    %8 = vector.load %arg10[%c0_6, %c0_7] : memref<8x128xf32, #tpu.memory_space<vmem>>, vector<8x128xf32>
    tpu.vector_store %arg10[%c0_6, %c0_7], %7 {strides = array<i32>} : memref<8x128xf32, #tpu.memory_space<vmem>>, vector<8x128xf32>,
    %c0_8 = arith.constant 0 : index
    %c0_9 = arith.constant 0 : index
    %9 = vector.load %arg6[%c0_8, %c0_9] : memref<8x128xf32, #tpu.memory_space<vmem>>, vector<8x128xf32>
    %10 = tpu.iota {dimensions = array<i32: 0>} : vector<8x128xi32>
    %11 = tpu.iota {dimensions = array<i32: 1>} : vector<8x128xi32>
    %12 = arith.cmpi eq, %11, %10 : vector<8x128xi32>
    %13 = tpu.iota {dimensions = array<i32: 1>} : vector<1x128xi32>
    %c0_10 = arith.constant 0 : index
    %c0_11 = arith.constant 0 : index
    %14 = vector.load %arg7[%c0_10, %c0_11] : memref<1x128xf32, #tpu.memory_space<vmem>>, vector<1x128xf32>
    %c0_12 = arith.constant 0 : index
    %c0_13 = arith.constant 0 : index
    %15 = vector.load %arg10[%c0_12, %c0_13] : memref<8x128xf32, #tpu.memory_space<vmem>>, vector<1x128xf32>
    %16 = arith.addf %14, %15 : vector<1x128xf32>
    %c0_i32 = arith.constant 0 : i32
    %17 = vector.broadcast %c0_i32 : i32 to vector<1x128xi32>
    %c0_14 = arith.constant 0 : index
    %c0_15 = arith.constant 0 : index
    %18 = vector.load %arg11[%c0_14, %c0_15] : memref<8x128xi32, #tpu.memory_space<vmem>>, vector<1x128xi32>
    tpu.vector_store %arg11[%c0_14, %c0_15], %17 {strides = array<i32>} : memref<8x128xi32, #tpu.memory_space<vmem>>, vector<1x128xi32>,
    %c8_i32 = arith.constant 8 : i32
    %19 = arith.muli %arg0, %c8_i32 : i32
    %c1_i32 = arith.constant 1 : i32
    %20 = arith.addi %19, %c1_i32 : i32
    %21 = arith.index_cast %20 : i32 to index
    %22 = memref.load %arg1[%21] : memref<16xi32, #tpu.memory_space<smem>>
    %c0_i32_16 = arith.constant 0 : i32
    %23 = arith.cmpi sgt, %22, %c0_i32_16 : i32
    %24 = vector.shape_cast %16 : vector<1x128xf32> to vector<1x128xf32>
    %25 = vector.broadcast %24 : vector<1x128xf32> to vector<8x128xf32>
    %cst_17 = arith.constant -1.000000e+30 : f32
    %26 = vector.broadcast %cst_17 : f32 to vector<8x128xf32>
    %27 = arith.select %12, %25, %26 : vector<8x128xi1>, vector<8x128xf32>
    %cst_18 = arith.constant dense<0xFF800000> : vector<8xf32>
    %28 = vector.multi_reduction <maximumf>, %27, %cst_18 [1] : vector<8x128xf32> to vector<8xf32>
    %29 = vector.shape_cast %28 : vector<8xf32> to vector<8x1xf32>
    %30 = vector.broadcast %29 : vector<8x1xf32> to vector<8x128xf32>
    %31 = arith.addf %30, %9 : vector<8x128xf32>
    %cst_19 = arith.constant dense<0xFF800000> : vector<128xf32>
    %32 = vector.multi_reduction <maximumf>, %31, %cst_19 [0] : vector<8x128xf32> to vector<128xf32>
    %33 = vector.shape_cast %32 : vector<128xf32> to vector<1x128xf32>
    %34 = vector.broadcast %33 : vector<1x128xf32> to vector<8x128xf32>
    %35 = arith.cmpf oeq, %31, %34 : vector<8x128xf32>
    %c8_i32_20 = arith.constant 8 : i32
    %36 = vector.broadcast %c8_i32_20 : i32 to vector<8x128xi32>
    %37 = arith.select %35, %10, %36 : vector<8x128xi1>, vector<8x128xi32>
    %cst_21 = arith.constant dense<2147483647> : vector<128xi32>
    %38 = vector.multi_reduction <minsi>, %37, %cst_21 [0] : vector<8x128xi32> to vector<128xi32>
    %39 = vector.shape_cast %38 : vector<128xi32> to vector<1x128xi32>
    %c1 = arith.constant 1 : index
    %c0_22 = arith.constant 0 : index
    %40 = vector.load %arg11[%c1, %c0_22] : memref<8x128xi32, #tpu.memory_space<vmem>>, vector<1x128xi32>
    tpu.vector_store %arg11[%c1, %c0_22], %39 {strides = array<i32>} : memref<8x128xi32, #tpu.memory_space<vmem>>, vector<1x128xi32>,
    %c1_23 = arith.constant 1 : index
    %c0_24 = arith.constant 0 : index
    %41 = vector.load %arg10[%c1_23, %c0_24] : memref<8x128xf32, #tpu.memory_space<vmem>>, vector<1x128xf32>
    %42 = arith.addf %33, %41 : vector<1x128xf32>
    %43 = arith.select %23, %42, %16 : vector<1x128xf32>
    %c8_i32_25 = arith.constant 8 : i32
    %44 = arith.muli %arg0, %c8_i32_25 : i32
    %c2_i32 = arith.constant 2 : i32
    %45 = arith.addi %44, %c2_i32 : i32
    %46 = arith.index_cast %45 : i32 to index
    %47 = memref.load %arg1[%46] : memref<16xi32, #tpu.memory_space<smem>>
    %c0_i32_26 = arith.constant 0 : i32
    %48 = arith.cmpi sgt, %47, %c0_i32_26 : i32
    %49 = vector.shape_cast %43 : vector<1x128xf32> to vector<1x128xf32>
    %50 = vector.broadcast %49 : vector<1x128xf32> to vector<8x128xf32>
    %cst_27 = arith.constant -1.000000e+30 : f32
    %51 = vector.broadcast %cst_27 : f32 to vector<8x128xf32>
    %52 = arith.select %12, %50, %51 : vector<8x128xi1>, vector<8x128xf32>
    %cst_28 = arith.constant dense<0xFF800000> : vector<8xf32>
    %53 = vector.multi_reduction <maximumf>, %52, %cst_28 [1] : vector<8x128xf32> to vector<8xf32>
    %54 = vector.shape_cast %53 : vector<8xf32> to vector<8x1xf32>
    %55 = vector.broadcast %54 : vector<8x1xf32> to vector<8x128xf32>
    %56 = arith.addf %55, %9 : vector<8x128xf32>
    %cst_29 = arith.constant dense<0xFF800000> : vector<128xf32>
    %57 = vector.multi_reduction <maximumf>, %56, %cst_29 [0] : vector<8x128xf32> to vector<128xf32>
    %58 = vector.shape_cast %57 : vector<128xf32> to vector<1x128xf32>
    %59 = vector.broadcast %58 : vector<1x128xf32> to vector<8x128xf32>
    %60 = arith.cmpf oeq, %56, %59 : vector<8x128xf32>
    %c8_i32_30 = arith.constant 8 : i32
    %61 = vector.broadcast %c8_i32_30 : i32 to vector<8x128xi32>
    %62 = arith.select %60, %10, %61 : vector<8x128xi1>, vector<8x128xi32>
    %cst_31 = arith.constant dense<2147483647> : vector<128xi32>
    %63 = vector.multi_reduction <minsi>, %62, %cst_31 [0] : vector<8x128xi32> to vector<128xi32>
    %64 = vector.shape_cast %63 : vector<128xi32> to vector<1x128xi32>
    %c2 = arith.constant 2 : index
    %c0_32 = arith.constant 0 : index
    %65 = vector.load %arg11[%c2, %c0_32] : memref<8x128xi32, #tpu.memory_space<vmem>>, vector<1x128xi32>
    tpu.vector_store %arg11[%c2, %c0_32], %64 {strides = array<i32>} : memref<8x128xi32, #tpu.memory_space<vmem>>, vector<1x128xi32>,
    %c2_33 = arith.constant 2 : index
    %c0_34 = arith.constant 0 : index
    %66 = vector.load %arg10[%c2_33, %c0_34] : memref<8x128xf32, #tpu.memory_space<vmem>>, vector<1x128xf32>
    %67 = arith.addf %58, %66 : vector<1x128xf32>
    %68 = arith.select %48, %67, %43 : vector<1x128xf32>
    %c8_i32_35 = arith.constant 8 : i32
    %69 = arith.muli %arg0, %c8_i32_35 : i32
    %c3_i32 = arith.constant 3 : i32
    %70 = arith.addi %69, %c3_i32 : i32
    %71 = arith.index_cast %70 : i32 to index
    %72 = memref.load %arg1[%71] : memref<16xi32, #tpu.memory_space<smem>>
    %c0_i32_36 = arith.constant 0 : i32
    %73 = arith.cmpi sgt, %72, %c0_i32_36 : i32
    %74 = vector.shape_cast %68 : vector<1x128xf32> to vector<1x128xf32>
    %75 = vector.broadcast %74 : vector<1x128xf32> to vector<8x128xf32>
    %cst_37 = arith.constant -1.000000e+30 : f32
    %76 = vector.broadcast %cst_37 : f32 to vector<8x128xf32>
    %77 = arith.select %12, %75, %76 : vector<8x128xi1>, vector<8x128xf32>
    %cst_38 = arith.constant dense<0xFF800000> : vector<8xf32>
    %78 = vector.multi_reduction <maximumf>, %77, %cst_38 [1] : vector<8x128xf32> to vector<8xf32>
    %79 = vector.shape_cast %78 : vector<8xf32> to vector<8x1xf32>
    %80 = vector.broadcast %79 : vector<8x1xf32> to vector<8x128xf32>
    %81 = arith.addf %80, %9 : vector<8x128xf32>
    %cst_39 = arith.constant dense<0xFF800000> : vector<128xf32>
    %82 = vector.multi_reduction <maximumf>, %81, %cst_39 [0] : vector<8x128xf32> to vector<128xf32>
    %83 = vector.shape_cast %82 : vector<128xf32> to vector<1x128xf32>
    %84 = vector.broadcast %83 : vector<1x128xf32> to vector<8x128xf32>
    %85 = arith.cmpf oeq, %81, %84 : vector<8x128xf32>
    %c8_i32_40 = arith.constant 8 : i32
    %86 = vector.broadcast %c8_i32_40 : i32 to vector<8x128xi32>
    %87 = arith.select %85, %10, %86 : vector<8x128xi1>, vector<8x128xi32>
    %cst_41 = arith.constant dense<2147483647> : vector<128xi32>
    %88 = vector.multi_reduction <minsi>, %87, %cst_41 [0] : vector<8x128xi32> to vector<128xi32>
    %89 = vector.shape_cast %88 : vector<128xi32> to vector<1x128xi32>
    %c3 = arith.constant 3 : index
    %c0_42 = arith.constant 0 : index
    %90 = vector.load %arg11[%c3, %c0_42] : memref<8x128xi32, #tpu.memory_space<vmem>>, vector<1x128xi32>
    tpu.vector_store %arg11[%c3, %c0_42], %89 {strides = array<i32>} : memref<8x128xi32, #tpu.memory_space<vmem>>, vector<1x128xi32>,
    %c3_43 = arith.constant 3 : index
    %c0_44 = arith.constant 0 : index
    %91 = vector.load %arg10[%c3_43, %c0_44] : memref<8x128xf32, #tpu.memory_space<vmem>>, vector<1x128xf32>
    %92 = arith.addf %83, %91 : vector<1x128xf32>
    %93 = arith.select %73, %92, %68 : vector<1x128xf32>
    %c8_i32_45 = arith.constant 8 : i32
    %94 = arith.muli %arg0, %c8_i32_45 : i32
    %c4_i32 = arith.constant 4 : i32
    %95 = arith.addi %94, %c4_i32 : i32
    %96 = arith.index_cast %95 : i32 to index
    %97 = memref.load %arg1[%96] : memref<16xi32, #tpu.memory_space<smem>>
    %c0_i32_46 = arith.constant 0 : i32
    %98 = arith.cmpi sgt, %97, %c0_i32_46 : i32
    %99 = vector.shape_cast %93 : vector<1x128xf32> to vector<1x128xf32>
    %100 = vector.broadcast %99 : vector<1x128xf32> to vector<8x128xf32>
    %cst_47 = arith.constant -1.000000e+30 : f32
    %101 = vector.broadcast %cst_47 : f32 to vector<8x128xf32>
    %102 = arith.select %12, %100, %101 : vector<8x128xi1>, vector<8x128xf32>
    %cst_48 = arith.constant dense<0xFF800000> : vector<8xf32>
    %103 = vector.multi_reduction <maximumf>, %102, %cst_48 [1] : vector<8x128xf32> to vector<8xf32>
    %104 = vector.shape_cast %103 : vector<8xf32> to vector<8x1xf32>
    %105 = vector.broadcast %104 : vector<8x1xf32> to vector<8x128xf32>
    %106 = arith.addf %105, %9 : vector<8x128xf32>
    %cst_49 = arith.constant dense<0xFF800000> : vector<128xf32>
    %107 = vector.multi_reduction <maximumf>, %106, %cst_49 [0] : vector<8x128xf32> to vector<128xf32>
    %108 = vector.shape_cast %107 : vector<128xf32> to vector<1x128xf32>
    %109 = vector.broadcast %108 : vector<1x128xf32> to vector<8x128xf32>
    %110 = arith.cmpf oeq, %106, %109 : vector<8x128xf32>
    %c8_i32_50 = arith.constant 8 : i32
    %111 = vector.broadcast %c8_i32_50 : i32 to vector<8x128xi32>
    %112 = arith.select %110, %10, %111 : vector<8x128xi1>, vector<8x128xi32>
    %cst_51 = arith.constant dense<2147483647> : vector<128xi32>
    %113 = vector.multi_reduction <minsi>, %112, %cst_51 [0] : vector<8x128xi32> to vector<128xi32>
    %114 = vector.shape_cast %113 : vector<128xi32> to vector<1x128xi32>
    %c4 = arith.constant 4 : index
    %c0_52 = arith.constant 0 : index
    %115 = vector.load %arg11[%c4, %c0_52] : memref<8x128xi32, #tpu.memory_space<vmem>>, vector<1x128xi32>
    tpu.vector_store %arg11[%c4, %c0_52], %114 {strides = array<i32>} : memref<8x128xi32, #tpu.memory_space<vmem>>, vector<1x128xi32>,
    %c4_53 = arith.constant 4 : index
    %c0_54 = arith.constant 0 : index
    %116 = vector.load %arg10[%c4_53, %c0_54] : memref<8x128xf32, #tpu.memory_space<vmem>>, vector<1x128xf32>
    %117 = arith.addf %108, %116 : vector<1x128xf32>
    %118 = arith.select %98, %117, %93 : vector<1x128xf32>
    %c8_i32_55 = arith.constant 8 : i32
    %119 = arith.muli %arg0, %c8_i32_55 : i32
    %c5_i32 = arith.constant 5 : i32
    %120 = arith.addi %119, %c5_i32 : i32
    %121 = arith.index_cast %120 : i32 to index
    %122 = memref.load %arg1[%121] : memref<16xi32, #tpu.memory_space<smem>>
    %c0_i32_56 = arith.constant 0 : i32
    %123 = arith.cmpi sgt, %122, %c0_i32_56 : i32
    %124 = vector.shape_cast %118 : vector<1x128xf32> to vector<1x128xf32>
    %125 = vector.broadcast %124 : vector<1x128xf32> to vector<8x128xf32>
    %cst_57 = arith.constant -1.000000e+30 : f32
    %126 = vector.broadcast %cst_57 : f32 to vector<8x128xf32>
    %127 = arith.select %12, %125, %126 : vector<8x128xi1>, vector<8x128xf32>
    %cst_58 = arith.constant dense<0xFF800000> : vector<8xf32>
    %128 = vector.multi_reduction <maximumf>, %127, %cst_58 [1] : vector<8x128xf32> to vector<8xf32>
    %129 = vector.shape_cast %128 : vector<8xf32> to vector<8x1xf32>
    %130 = vector.broadcast %129 : vector<8x1xf32> to vector<8x128xf32>
    %131 = arith.addf %130, %9 : vector<8x128xf32>
    %cst_59 = arith.constant dense<0xFF800000> : vector<128xf32>
    %132 = vector.multi_reduction <maximumf>, %131, %cst_59 [0] : vector<8x128xf32> to vector<128xf32>
    %133 = vector.shape_cast %132 : vector<128xf32> to vector<1x128xf32>
    %134 = vector.broadcast %133 : vector<1x128xf32> to vector<8x128xf32>
    %135 = arith.cmpf oeq, %131, %134 : vector<8x128xf32>
    %c8_i32_60 = arith.constant 8 : i32
    %136 = vector.broadcast %c8_i32_60 : i32 to vector<8x128xi32>
    %137 = arith.select %135, %10, %136 : vector<8x128xi1>, vector<8x128xi32>
    %cst_61 = arith.constant dense<2147483647> : vector<128xi32>
    %138 = vector.multi_reduction <minsi>, %137, %cst_61 [0] : vector<8x128xi32> to vector<128xi32>
    %139 = vector.shape_cast %138 : vector<128xi32> to vector<1x128xi32>
    %c5 = arith.constant 5 : index
    %c0_62 = arith.constant 0 : index
    %140 = vector.load %arg11[%c5, %c0_62] : memref<8x128xi32, #tpu.memory_space<vmem>>, vector<1x128xi32>
    tpu.vector_store %arg11[%c5, %c0_62], %139 {strides = array<i32>} : memref<8x128xi32, #tpu.memory_space<vmem>>, vector<1x128xi32>,
    %c5_63 = arith.constant 5 : index
    %c0_64 = arith.constant 0 : index
    %141 = vector.load %arg10[%c5_63, %c0_64] : memref<8x128xf32, #tpu.memory_space<vmem>>, vector<1x128xf32>
    %142 = arith.addf %133, %141 : vector<1x128xf32>
    %143 = arith.select %123, %142, %118 : vector<1x128xf32>
    %c8_i32_65 = arith.constant 8 : i32
    %144 = arith.muli %arg0, %c8_i32_65 : i32
    %c6_i32 = arith.constant 6 : i32
    %145 = arith.addi %144, %c6_i32 : i32
    %146 = arith.index_cast %145 : i32 to index
    %147 = memref.load %arg1[%146] : memref<16xi32, #tpu.memory_space<smem>>
    %c0_i32_66 = arith.constant 0 : i32
    %148 = arith.cmpi sgt, %147, %c0_i32_66 : i32
    %149 = vector.shape_cast %143 : vector<1x128xf32> to vector<1x128xf32>
    %150 = vector.broadcast %149 : vector<1x128xf32> to vector<8x128xf32>
    %cst_67 = arith.constant -1.000000e+30 : f32
    %151 = vector.broadcast %cst_67 : f32 to vector<8x128xf32>
    %152 = arith.select %12, %150, %151 : vector<8x128xi1>, vector<8x128xf32>
    %cst_68 = arith.constant dense<0xFF800000> : vector<8xf32>
    %153 = vector.multi_reduction <maximumf>, %152, %cst_68 [1] : vector<8x128xf32> to vector<8xf32>
    %154 = vector.shape_cast %153 : vector<8xf32> to vector<8x1xf32>
    %155 = vector.broadcast %154 : vector<8x1xf32> to vector<8x128xf32>
    %156 = arith.addf %155, %9 : vector<8x128xf32>
    %cst_69 = arith.constant dense<0xFF800000> : vector<128xf32>
    %157 = vector.multi_reduction <maximumf>, %156, %cst_69 [0] : vector<8x128xf32> to vector<128xf32>
    %158 = vector.shape_cast %157 : vector<128xf32> to vector<1x128xf32>
    %159 = vector.broadcast %158 : vector<1x128xf32> to vector<8x128xf32>
    %160 = arith.cmpf oeq, %156, %159 : vector<8x128xf32>
    %c8_i32_70 = arith.constant 8 : i32
    %161 = vector.broadcast %c8_i32_70 : i32 to vector<8x128xi32>
    %162 = arith.select %160, %10, %161 : vector<8x128xi1>, vector<8x128xi32>
    %cst_71 = arith.constant dense<2147483647> : vector<128xi32>
    %163 = vector.multi_reduction <minsi>, %162, %cst_71 [0] : vector<8x128xi32> to vector<128xi32>
    %164 = vector.shape_cast %163 : vector<128xi32> to vector<1x128xi32>
    %c6 = arith.constant 6 : index
    %c0_72 = arith.constant 0 : index
    %165 = vector.load %arg11[%c6, %c0_72] : memref<8x128xi32, #tpu.memory_space<vmem>>, vector<1x128xi32>
    tpu.vector_store %arg11[%c6, %c0_72], %164 {strides = array<i32>} : memref<8x128xi32, #tpu.memory_space<vmem>>, vector<1x128xi32>,
    %c6_73 = arith.constant 6 : index
    %c0_74 = arith.constant 0 : index
    %166 = vector.load %arg10[%c6_73, %c0_74] : memref<8x128xf32, #tpu.memory_space<vmem>>, vector<1x128xf32>
    %167 = arith.addf %158, %166 : vector<1x128xf32>
    %168 = arith.select %148, %167, %143 : vector<1x128xf32>
    %c8_i32_75 = arith.constant 8 : i32
    %169 = arith.muli %arg0, %c8_i32_75 : i32
    %c7_i32 = arith.constant 7 : i32
    %170 = arith.addi %169, %c7_i32 : i32
    %171 = arith.index_cast %170 : i32 to index
    %172 = memref.load %arg1[%171] : memref<16xi32, #tpu.memory_space<smem>>
    %c0_i32_76 = arith.constant 0 : i32
    %173 = arith.cmpi sgt, %172, %c0_i32_76 : i32
    %174 = vector.shape_cast %168 : vector<1x128xf32> to vector<1x128xf32>
    %175 = vector.broadcast %174 : vector<1x128xf32> to vector<8x128xf32>
    %cst_77 = arith.constant -1.000000e+30 : f32
    %176 = vector.broadcast %cst_77 : f32 to vector<8x128xf32>
    %177 = arith.select %12, %175, %176 : vector<8x128xi1>, vector<8x128xf32>
    %cst_78 = arith.constant dense<0xFF800000> : vector<8xf32>
    %178 = vector.multi_reduction <maximumf>, %177, %cst_78 [1] : vector<8x128xf32> to vector<8xf32>
    %179 = vector.shape_cast %178 : vector<8xf32> to vector<8x1xf32>
    %180 = vector.broadcast %179 : vector<8x1xf32> to vector<8x128xf32>
    %181 = arith.addf %180, %9 : vector<8x128xf32>
    %cst_79 = arith.constant dense<0xFF800000> : vector<128xf32>
    %182 = vector.multi_reduction <maximumf>, %181, %cst_79 [0] : vector<8x128xf32> to vector<128xf32>
    %183 = vector.shape_cast %182 : vector<128xf32> to vector<1x128xf32>
    %184 = vector.broadcast %183 : vector<1x128xf32> to vector<8x128xf32>
    %185 = arith.cmpf oeq, %181, %184 : vector<8x128xf32>
    %c8_i32_80 = arith.constant 8 : i32
    %186 = vector.broadcast %c8_i32_80 : i32 to vector<8x128xi32>
    %187 = arith.select %185, %10, %186 : vector<8x128xi1>, vector<8x128xi32>
    %cst_81 = arith.constant dense<2147483647> : vector<128xi32>
    %188 = vector.multi_reduction <minsi>, %187, %cst_81 [0] : vector<8x128xi32> to vector<128xi32>
    %189 = vector.shape_cast %188 : vector<128xi32> to vector<1x128xi32>
    %c7 = arith.constant 7 : index
    %c0_82 = arith.constant 0 : index
    %190 = vector.load %arg11[%c7, %c0_82] : memref<8x128xi32, #tpu.memory_space<vmem>>, vector<1x128xi32>
    tpu.vector_store %arg11[%c7, %c0_82], %189 {strides = array<i32>} : memref<8x128xi32, #tpu.memory_space<vmem>>, vector<1x128xi32>,
    %c7_83 = arith.constant 7 : index
    %c0_84 = arith.constant 0 : index
    %191 = vector.load %arg10[%c7_83, %c0_84] : memref<8x128xf32, #tpu.memory_space<vmem>>, vector<1x128xf32>
    %192 = arith.addf %183, %191 : vector<1x128xf32>
    %193 = arith.select %173, %192, %168 : vector<1x128xf32>
    %c0_85 = arith.constant 0 : index
    %c0_86 = arith.constant 0 : index
    %194 = vector.load %arg8[%c0_85, %c0_86] : memref<1x128xf32, #tpu.memory_space<vmem>>, vector<1x128xf32>
    %195 = arith.addf %193, %194 : vector<1x128xf32>
    %cst_87 = arith.constant dense<0xFF800000> : vector<1xf32>
    %196 = vector.multi_reduction <maximumf>, %195, %cst_87 [1] : vector<1x128xf32> to vector<1xf32>
    %197 = vector.shape_cast %196 : vector<1xf32> to vector<1x1xf32>
    %198 = vector.broadcast %197 : vector<1x1xf32> to vector<1x128xf32>
    %199 = arith.cmpf oeq, %195, %198 : vector<1x128xf32>
    %c128_i32 = arith.constant 128 : i32
    %200 = vector.broadcast %c128_i32 : i32 to vector<1x128xi32>
    %201 = arith.select %199, %13, %200 : vector<1x128xi1>, vector<1x128xi32>
    %cst_88 = arith.constant dense<2147483647> : vector<1xi32>
    %202 = vector.multi_reduction <minsi>, %201, %cst_88 [1] : vector<1x128xi32> to vector<1xi32>
    %203 = vector.shape_cast %202 : vector<1xi32> to vector<1x1xi32>
    %204 = arith.index_cast %arg0 : i32 to index
    %205 = memref.load %arg2[%204] : memref<2xi32, #tpu.memory_space<smem>>
    %206 = tpu.iota {dimensions = array<i32: 1>} : vector<1x8xi32>
    %c0_i32_89 = arith.constant 0 : i32
    %207 = vector.broadcast %c0_i32_89 : i32 to vector<1x1xi32>
    %c0_i32_90 = arith.constant 0 : i32
    %208 = vector.broadcast %c0_i32_90 : i32 to vector<1x8xi32>
    %c8_i32_91 = arith.constant 8 : i32
    %c7_i32_92 = arith.constant 7 : i32
    %209 = arith.minsi %c8_i32_91, %c7_i32_92 : i32
    %210 = arith.index_cast %209 : i32 to index
    %c0_93 = arith.constant 0 : index
    %211 = vector.load %arg11[%210, %c0_93] : memref<8x128xi32, #tpu.memory_space<vmem>>, vector<1x128xi32>
    %212 = vector.broadcast %207 : vector<1x1xi32> to vector<1x128xi32>
    %213 = arith.cmpi eq, %13, %212 : vector<1x128xi32>
    %c0_i32_94 = arith.constant 0 : i32
    %214 = vector.broadcast %c0_i32_94 : i32 to vector<1x128xi32>
    %215 = arith.select %213, %211, %214 : vector<1x128xi1>, vector<1x128xi32>
    %cst_95 = arith.constant dense<0> : vector<1xi32>
    %216 = vector.multi_reduction <add>, %215, %cst_95 [1] : vector<1x128xi32> to vector<1xi32>
    %217 = vector.shape_cast %216 : vector<1xi32> to vector<1x1xi32>
    %c7_i32_96 = arith.constant 7 : i32
    %218 = arith.cmpi eq, %205, %c7_i32_96 : i32
    %c7_i32_97 = arith.constant 7 : i32
    %219 = arith.cmpi sgt, %205, %c7_i32_97 : i32
    %c0_i32_98 = arith.constant 0 : i32
    %220 = vector.broadcast %c0_i32_98 : i32 to vector<1x1xi32>
    %221 = arith.select %219, %217, %220 : vector<1x1xi32>
    %222 = arith.select %218, %203, %221 : vector<1x1xi32>
    %c7_i32_99 = arith.constant 7 : i32
    %223 = vector.broadcast %c7_i32_99 : i32 to vector<1x8xi32>
    %224 = arith.cmpi eq, %206, %223 : vector<1x8xi32>
    %225 = vector.shape_cast %222 : vector<1x1xi32> to vector<1x1xi32>
    %226 = vector.broadcast %225 : vector<1x1xi32> to vector<1x8xi32>
    %227 = arith.select %224, %226, %208 : vector<1x8xi1>, vector<1x8xi32>
    %c7_i32_100 = arith.constant 7 : i32
    %c7_i32_101 = arith.constant 7 : i32
    %228 = arith.minsi %c7_i32_100, %c7_i32_101 : i32
    %229 = arith.index_cast %228 : i32 to index
    %c0_102 = arith.constant 0 : index
    %230 = vector.load %arg11[%229, %c0_102] : memref<8x128xi32, #tpu.memory_space<vmem>>, vector<1x128xi32>
    %231 = vector.broadcast %222 : vector<1x1xi32> to vector<1x128xi32>
    %232 = arith.cmpi eq, %13, %231 : vector<1x128xi32>
    %c0_i32_103 = arith.constant 0 : i32
    %233 = vector.broadcast %c0_i32_103 : i32 to vector<1x128xi32>
    %234 = arith.select %232, %230, %233 : vector<1x128xi1>, vector<1x128xi32>
    %cst_104 = arith.constant dense<0> : vector<1xi32>
    %235 = vector.multi_reduction <add>, %234, %cst_104 [1] : vector<1x128xi32> to vector<1xi32>
    %236 = vector.shape_cast %235 : vector<1xi32> to vector<1x1xi32>
    %c6_i32_105 = arith.constant 6 : i32
    %237 = arith.cmpi eq, %205, %c6_i32_105 : i32
    %c6_i32_106 = arith.constant 6 : i32
    %238 = arith.cmpi sgt, %205, %c6_i32_106 : i32
    %c0_i32_107 = arith.constant 0 : i32
    %239 = vector.broadcast %c0_i32_107 : i32 to vector<1x1xi32>
    %240 = arith.select %238, %236, %239 : vector<1x1xi32>
    %241 = arith.select %237, %203, %240 : vector<1x1xi32>
    %c6_i32_108 = arith.constant 6 : i32
    %242 = vector.broadcast %c6_i32_108 : i32 to vector<1x8xi32>
    %243 = arith.cmpi eq, %206, %242 : vector<1x8xi32>
    %244 = vector.shape_cast %241 : vector<1x1xi32> to vector<1x1xi32>
    %245 = vector.broadcast %244 : vector<1x1xi32> to vector<1x8xi32>
    %246 = arith.select %243, %245, %227 : vector<1x8xi1>, vector<1x8xi32>
    %c6_i32_109 = arith.constant 6 : i32
    %c7_i32_110 = arith.constant 7 : i32
    %247 = arith.minsi %c6_i32_109, %c7_i32_110 : i32
    %248 = arith.index_cast %247 : i32 to index
    %c0_111 = arith.constant 0 : index
    %249 = vector.load %arg11[%248, %c0_111] : memref<8x128xi32, #tpu.memory_space<vmem>>, vector<1x128xi32>
    %250 = vector.broadcast %241 : vector<1x1xi32> to vector<1x128xi32>
    %251 = arith.cmpi eq, %13, %250 : vector<1x128xi32>
    %c0_i32_112 = arith.constant 0 : i32
    %252 = vector.broadcast %c0_i32_112 : i32 to vector<1x128xi32>
    %253 = arith.select %251, %249, %252 : vector<1x128xi1>, vector<1x128xi32>
    %cst_113 = arith.constant dense<0> : vector<1xi32>
    %254 = vector.multi_reduction <add>, %253, %cst_113 [1] : vector<1x128xi32> to vector<1xi32>
    %255 = vector.shape_cast %254 : vector<1xi32> to vector<1x1xi32>
    %c5_i32_114 = arith.constant 5 : i32
    %256 = arith.cmpi eq, %205, %c5_i32_114 : i32
    %c5_i32_115 = arith.constant 5 : i32
    %257 = arith.cmpi sgt, %205, %c5_i32_115 : i32
    %c0_i32_116 = arith.constant 0 : i32
    %258 = vector.broadcast %c0_i32_116 : i32 to vector<1x1xi32>
    %259 = arith.select %257, %255, %258 : vector<1x1xi32>
    %260 = arith.select %256, %203, %259 : vector<1x1xi32>
    %c5_i32_117 = arith.constant 5 : i32
    %261 = vector.broadcast %c5_i32_117 : i32 to vector<1x8xi32>
    %262 = arith.cmpi eq, %206, %261 : vector<1x8xi32>
    %263 = vector.shape_cast %260 : vector<1x1xi32> to vector<1x1xi32>
    %264 = vector.broadcast %263 : vector<1x1xi32> to vector<1x8xi32>
    %265 = arith.select %262, %264, %246 : vector<1x8xi1>, vector<1x8xi32>
    %c5_i32_118 = arith.constant 5 : i32
    %c7_i32_119 = arith.constant 7 : i32
    %266 = arith.minsi %c5_i32_118, %c7_i32_119 : i32
    %267 = arith.index_cast %266 : i32 to index
    %c0_120 = arith.constant 0 : index
    %268 = vector.load %arg11[%267, %c0_120] : memref<8x128xi32, #tpu.memory_space<vmem>>, vector<1x128xi32>
    %269 = vector.broadcast %260 : vector<1x1xi32> to vector<1x128xi32>
    %270 = arith.cmpi eq, %13, %269 : vector<1x128xi32>
    %c0_i32_121 = arith.constant 0 : i32
    %271 = vector.broadcast %c0_i32_121 : i32 to vector<1x128xi32>
    %272 = arith.select %270, %268, %271 : vector<1x128xi1>, vector<1x128xi32>
    %cst_122 = arith.constant dense<0> : vector<1xi32>
    %273 = vector.multi_reduction <add>, %272, %cst_122 [1] : vector<1x128xi32> to vector<1xi32>
    %274 = vector.shape_cast %273 : vector<1xi32> to vector<1x1xi32>
    %c4_i32_123 = arith.constant 4 : i32
    %275 = arith.cmpi eq, %205, %c4_i32_123 : i32
    %c4_i32_124 = arith.constant 4 : i32
    %276 = arith.cmpi sgt, %205, %c4_i32_124 : i32
    %c0_i32_125 = arith.constant 0 : i32
    %277 = vector.broadcast %c0_i32_125 : i32 to vector<1x1xi32>
    %278 = arith.select %276, %274, %277 : vector<1x1xi32>
    %279 = arith.select %275, %203, %278 : vector<1x1xi32>
    %c4_i32_126 = arith.constant 4 : i32
    %280 = vector.broadcast %c4_i32_126 : i32 to vector<1x8xi32>
    %281 = arith.cmpi eq, %206, %280 : vector<1x8xi32>
    %282 = vector.shape_cast %279 : vector<1x1xi32> to vector<1x1xi32>
    %283 = vector.broadcast %282 : vector<1x1xi32> to vector<1x8xi32>
    %284 = arith.select %281, %283, %265 : vector<1x8xi1>, vector<1x8xi32>
    %c4_i32_127 = arith.constant 4 : i32
    %c7_i32_128 = arith.constant 7 : i32
    %285 = arith.minsi %c4_i32_127, %c7_i32_128 : i32
    %286 = arith.index_cast %285 : i32 to index
    %c0_129 = arith.constant 0 : index
    %287 = vector.load %arg11[%286, %c0_129] : memref<8x128xi32, #tpu.memory_space<vmem>>, vector<1x128xi32>
    %288 = vector.broadcast %279 : vector<1x1xi32> to vector<1x128xi32>
    %289 = arith.cmpi eq, %13, %288 : vector<1x128xi32>
    %c0_i32_130 = arith.constant 0 : i32
    %290 = vector.broadcast %c0_i32_130 : i32 to vector<1x128xi32>
    %291 = arith.select %289, %287, %290 : vector<1x128xi1>, vector<1x128xi32>
    %cst_131 = arith.constant dense<0> : vector<1xi32>
    %292 = vector.multi_reduction <add>, %291, %cst_131 [1] : vector<1x128xi32> to vector<1xi32>
    %293 = vector.shape_cast %292 : vector<1xi32> to vector<1x1xi32>
    %c3_i32_132 = arith.constant 3 : i32
    %294 = arith.cmpi eq, %205, %c3_i32_132 : i32
    %c3_i32_133 = arith.constant 3 : i32
    %295 = arith.cmpi sgt, %205, %c3_i32_133 : i32
    %c0_i32_134 = arith.constant 0 : i32
    %296 = vector.broadcast %c0_i32_134 : i32 to vector<1x1xi32>
    %297 = arith.select %295, %293, %296 : vector<1x1xi32>
    %298 = arith.select %294, %203, %297 : vector<1x1xi32>
    %c3_i32_135 = arith.constant 3 : i32
    %299 = vector.broadcast %c3_i32_135 : i32 to vector<1x8xi32>
    %300 = arith.cmpi eq, %206, %299 : vector<1x8xi32>
    %301 = vector.shape_cast %298 : vector<1x1xi32> to vector<1x1xi32>
    %302 = vector.broadcast %301 : vector<1x1xi32> to vector<1x8xi32>
    %303 = arith.select %300, %302, %284 : vector<1x8xi1>, vector<1x8xi32>
    %c3_i32_136 = arith.constant 3 : i32
    %c7_i32_137 = arith.constant 7 : i32
    %304 = arith.minsi %c3_i32_136, %c7_i32_137 : i32
    %305 = arith.index_cast %304 : i32 to index
    %c0_138 = arith.constant 0 : index
    %306 = vector.load %arg11[%305, %c0_138] : memref<8x128xi32, #tpu.memory_space<vmem>>, vector<1x128xi32>
    %307 = vector.broadcast %298 : vector<1x1xi32> to vector<1x128xi32>
    %308 = arith.cmpi eq, %13, %307 : vector<1x128xi32>
    %c0_i32_139 = arith.constant 0 : i32
    %309 = vector.broadcast %c0_i32_139 : i32 to vector<1x128xi32>
    %310 = arith.select %308, %306, %309 : vector<1x128xi1>, vector<1x128xi32>
    %cst_140 = arith.constant dense<0> : vector<1xi32>
    %311 = vector.multi_reduction <add>, %310, %cst_140 [1] : vector<1x128xi32> to vector<1xi32>
    %312 = vector.shape_cast %311 : vector<1xi32> to vector<1x1xi32>
    %c2_i32_141 = arith.constant 2 : i32
    %313 = arith.cmpi eq, %205, %c2_i32_141 : i32
    %c2_i32_142 = arith.constant 2 : i32
    %314 = arith.cmpi sgt, %205, %c2_i32_142 : i32
    %c0_i32_143 = arith.constant 0 : i32
    %315 = vector.broadcast %c0_i32_143 : i32 to vector<1x1xi32>
    %316 = arith.select %314, %312, %315 : vector<1x1xi32>
    %317 = arith.select %313, %203, %316 : vector<1x1xi32>
    %c2_i32_144 = arith.constant 2 : i32
    %318 = vector.broadcast %c2_i32_144 : i32 to vector<1x8xi32>
    %319 = arith.cmpi eq, %206, %318 : vector<1x8xi32>
    %320 = vector.shape_cast %317 : vector<1x1xi32> to vector<1x1xi32>
    %321 = vector.broadcast %320 : vector<1x1xi32> to vector<1x8xi32>
    %322 = arith.select %319, %321, %303 : vector<1x8xi1>, vector<1x8xi32>
    %c2_i32_145 = arith.constant 2 : i32
    %c7_i32_146 = arith.constant 7 : i32
    %323 = arith.minsi %c2_i32_145, %c7_i32_146 : i32
    %324 = arith.index_cast %323 : i32 to index
    %c0_147 = arith.constant 0 : index
    %325 = vector.load %arg11[%324, %c0_147] : memref<8x128xi32, #tpu.memory_space<vmem>>, vector<1x128xi32>
    %326 = vector.broadcast %317 : vector<1x1xi32> to vector<1x128xi32>
    %327 = arith.cmpi eq, %13, %326 : vector<1x128xi32>
    %c0_i32_148 = arith.constant 0 : i32
    %328 = vector.broadcast %c0_i32_148 : i32 to vector<1x128xi32>
    %329 = arith.select %327, %325, %328 : vector<1x128xi1>, vector<1x128xi32>
    %cst_149 = arith.constant dense<0> : vector<1xi32>
    %330 = vector.multi_reduction <add>, %329, %cst_149 [1] : vector<1x128xi32> to vector<1xi32>
    %331 = vector.shape_cast %330 : vector<1xi32> to vector<1x1xi32>
    %c1_i32_150 = arith.constant 1 : i32
    %332 = arith.cmpi eq, %205, %c1_i32_150 : i32
    %c1_i32_151 = arith.constant 1 : i32
    %333 = arith.cmpi sgt, %205, %c1_i32_151 : i32
    %c0_i32_152 = arith.constant 0 : i32
    %334 = vector.broadcast %c0_i32_152 : i32 to vector<1x1xi32>
    %335 = arith.select %333, %331, %334 : vector<1x1xi32>
    %336 = arith.select %332, %203, %335 : vector<1x1xi32>
    %c1_i32_153 = arith.constant 1 : i32
    %337 = vector.broadcast %c1_i32_153 : i32 to vector<1x8xi32>
    %338 = arith.cmpi eq, %206, %337 : vector<1x8xi32>
    %339 = vector.shape_cast %336 : vector<1x1xi32> to vector<1x1xi32>
    %340 = vector.broadcast %339 : vector<1x1xi32> to vector<1x8xi32>
    %341 = arith.select %338, %340, %322 : vector<1x8xi1>, vector<1x8xi32>
    %c1_i32_154 = arith.constant 1 : i32
    %c7_i32_155 = arith.constant 7 : i32
    %342 = arith.minsi %c1_i32_154, %c7_i32_155 : i32
    %343 = arith.index_cast %342 : i32 to index
    %c0_156 = arith.constant 0 : index
    %344 = vector.load %arg11[%343, %c0_156] : memref<8x128xi32, #tpu.memory_space<vmem>>, vector<1x128xi32>
    %345 = vector.broadcast %336 : vector<1x1xi32> to vector<1x128xi32>
    %346 = arith.cmpi eq, %13, %345 : vector<1x128xi32>
    %c0_i32_157 = arith.constant 0 : i32
    %347 = vector.broadcast %c0_i32_157 : i32 to vector<1x128xi32>
    %348 = arith.select %346, %344, %347 : vector<1x128xi1>, vector<1x128xi32>
    %cst_158 = arith.constant dense<0> : vector<1xi32>
    %349 = vector.multi_reduction <add>, %348, %cst_158 [1] : vector<1x128xi32> to vector<1xi32>
    %350 = vector.shape_cast %349 : vector<1xi32> to vector<1x1xi32>
    %c0_i32_159 = arith.constant 0 : i32
    %351 = arith.cmpi eq, %205, %c0_i32_159 : i32
    %c0_i32_160 = arith.constant 0 : i32
    %352 = arith.cmpi sgt, %205, %c0_i32_160 : i32
    %c0_i32_161 = arith.constant 0 : i32
    %353 = vector.broadcast %c0_i32_161 : i32 to vector<1x1xi32>
    %354 = arith.select %352, %350, %353 : vector<1x1xi32>
    %355 = arith.select %351, %203, %354 : vector<1x1xi32>
    %c0_i32_162 = arith.constant 0 : i32
    %356 = vector.broadcast %c0_i32_162 : i32 to vector<1x8xi32>
    %357 = arith.cmpi eq, %206, %356 : vector<1x8xi32>
    %358 = vector.shape_cast %355 : vector<1x1xi32> to vector<1x1xi32>
    %359 = vector.broadcast %358 : vector<1x1xi32> to vector<1x8xi32>
    %360 = arith.select %357, %359, %341 : vector<1x8xi1>, vector<1x8xi32>
    %361 = vector.shape_cast %360 : vector<1x8xi32> to vector<1x1x8xi32>
    %c0_163 = arith.constant 0 : index
    %c0_164 = arith.constant 0 : index
    %c0_165 = arith.constant 0 : index
    %362 = vector.load %arg9[%c0_163, %c0_164, %c0_165] : memref<1x1x8xi32, #tpu.memory_space<vmem>>, vector<1x1x8xi32>
    tpu.vector_store %arg9[%c0_163, %c0_164, %c0_165], %361 {strides = array<i32>} : memref<1x1x8xi32, #tpu.memory_space<vmem>>, vector<1x1x8xi32>,
    return
  }
  func.func @transform_0(%arg0: i32, %arg1: memref<16xi32, #tpu.memory_space<smem>>, %arg2: memref<2xi32, #tpu.memory_space<smem>>) -> (i32, i32, i32) {
    %c0_i32 = arith.constant 0 : i32
    %c0_i32_0 = arith.constant 0 : i32
    %c0_i32_1 = arith.constant 0 : i32
    return %arg0, %c0_i32, %c0_i32_0 : i32, i32, i32
  }
  func.func @transform_1(%arg0: i32, %arg1: memref<16xi32, #tpu.memory_space<smem>>, %arg2: memref<2xi32, #tpu.memory_space<smem>>) -> (i32, i32) {
    %c0_i32 = arith.constant 0 : i32
    %c0_i32_0 = arith.constant 0 : i32
    %c0_i32_1 = arith.constant 0 : i32
    return %c0_i32, %c0_i32_0 : i32, i32
  }
  func.func @transform_2(%arg0: i32, %arg1: memref<16xi32, #tpu.memory_space<smem>>, %arg2: memref<2xi32, #tpu.memory_space<smem>>) -> (i32, i32) {
    %c0_i32 = arith.constant 0 : i32
    %c0_i32_0 = arith.constant 0 : i32
    %c0_i32_1 = arith.constant 0 : i32
    return %c0_i32, %c0_i32_0 : i32, i32
  }
  func.func @transform_3(%arg0: i32, %arg1: memref<16xi32, #tpu.memory_space<smem>>, %arg2: memref<2xi32, #tpu.memory_space<smem>>) -> (i32, i32) {
    %c0_i32 = arith.constant 0 : i32
    %c0_i32_0 = arith.constant 0 : i32
    %c0_i32_1 = arith.constant 0 : i32
    return %c0_i32, %c0_i32_0 : i32, i32
  }
  func.func @transform_4(%arg0: i32, %arg1: memref<16xi32, #tpu.memory_space<smem>>, %arg2: memref<2xi32, #tpu.memory_space<smem>>) -> (i32, i32) {
    %c0_i32 = arith.constant 0 : i32
    %c0_i32_0 = arith.constant 0 : i32
    %c0_i32_1 = arith.constant 0 : i32
    return %c0_i32, %c0_i32_0 : i32, i32
  }
  func.func @transform_5(%arg0: i32, %arg1: memref<16xi32, #tpu.memory_space<smem>>, %arg2: memref<2xi32, #tpu.memory_space<smem>>) -> (i32, i32) {
    %c0_i32 = arith.constant 0 : i32
    %c0_i32_0 = arith.constant 0 : i32
    %c0_i32_1 = arith.constant 0 : i32
    return %c0_i32, %c0_i32_0 : i32, i32
  }
  func.func @transform_6(%arg0: i32, %arg1: memref<16xi32, #tpu.memory_space<smem>>, %arg2: memref<2xi32, #tpu.memory_space<smem>>) -> (i32, i32, i32) {
    %c0_i32 = arith.constant 0 : i32
    %c0_i32_0 = arith.constant 0 : i32
    %c0_i32_1 = arith.constant 0 : i32
    return %arg0, %c0_i32, %c0_i32_0 : i32, i32, i32
  }
}

</mosaic_0001>

<bundles_post_ra>
// kernel: tpu_custom_call.1
= control target key start
LH: loop header
LB: loop body
LE: loop exit
PB: predicated region body
PF: predicated region fallthrough
CT: control target
= control target key end

     0   :  { %s1893_s11 = smov [#allocation5]   ;;  %s1894_s12 = smov [#allocation6]   ;;  %s2216_s0 = inlined_call_operand.hbm [shape: s32[16], index: 0, kind: input, shape index: {}]   ;;  %s2217_s2 = inlined_call_operand.hbm [shape: f32[2,8,768], index: 2, kind: input, shape index: {}]   ;;  %s2218_s3 = inlined_call_operand.hbm [shape: bf16[768,128], index: 3, kind: input, shape index: {}]   ;;  %s2219_s4 = inlined_call_operand.vmem [shape: f32[1,128], index: 4, kind: input, shape index: {}]   ;;  %s2220_s5 = inlined_call_operand.hbm [shape: f32[8,128], index: 5, kind: input, shape index: {}]   ;;  %s2221_s6 = inlined_call_operand.vmem [shape: f32[1,128], index: 6, kind: input, shape index: {}]   ;;  %s2222_s7 = inlined_call_operand.vmem [shape: f32[1,128], index: 7, kind: input, shape index: {}]   ;;  %s2223_s8 = inlined_call_operand.hbm [shape: s32[2,1,8], index: 8, kind: output, shape index: {}]   ;;  %s2224_s1 = inlined_call_operand.hbm [shape: s32[2], index: 1, kind: input, shape index: {}]  }
   0x1   :  { %2225 = sst [smem:[#allocation18_spill]] %s2218_s3  ;;  %s14_s29 = sshll.u32 %s2216_s0, 4  ;;  %s15_s29 = int_to_ptr.hbm [resolvable:$true] %s14_s29 }
   0x2   :  { %2226 = sst [smem:[#allocation19_spill]] %s2220_s5  ;;  %s19_s10 = sshll.u32 %s2224_s1, 4  ;;  %s20_s10 = int_to_ptr.hbm [resolvable:$true] %s19_s10 }
   0x3   :  { %17 = dma.hbm_to_smem %s15_s29, 16, %s1893_s11, [#allocation4] }
   0x4   :  { %22 = dma.hbm_to_smem %s20_s10, 16, %s1894_s12, [#allocation4] }
   0x5   :  { %1863 = dma.done.wait [#allocation4], 32 }
   0x6   :  { %1864 = vsyncadd [#allocation4], 4294967264 }
   0x7   :  { %25 = sfence }
   0x8   :  { %26 = vsyncpa [#allocation8], 0 }
   0x9   :  { %28 = vsyncpa [#allocation8 + $0x1], 0 }
   0xa   :  { %29 = vsyncpa [#allocation11], 0 }
   0xb   :  { %30 = vsyncpa [#allocation9], 0 }
   0xc   :  { %32 = vsyncpa [#allocation9 + $0x1], 0  ;;  %s1950_s13 = smov 0   ;;  %s1952_s0 = smov 0  }
   0xd   :  { %s1954_s14 = smov 0   ;;  %s1956_s1 = smov 0  }
   0xe LB: > { %s2227_s3 = sld [smem:[#allocation18_spill]]  ;;  %s1974_s18 = sadd.s32 4294967295, %s1891_s1   ;;  %s1891_s1 = sphi %s1956_s1, %s2240_s1   ;;  %s1887_s14 = sphi %s1954_s14, %s2239_s14   ;;  %s1883_s0 = sphi %s1952_s0, %s2238_s0   ;;  %s1879_s13 = sphi %s1950_s13, %s2237_s13  }
   0xf   : > { %p1378_p0 = scmp.ge.s32.totalorder %s1891_s1, 1  ;;  %p59_p1 = scmp.eq.s32.totalorder %s1974_s18, 0 }
  0x10   : > { %p200_p2 = scmp.lt.s32.totalorder %s1891_s1, 3  ;;  %s1895_s20 = smov [#allocation10]  }
  0x11   : > { %s213_s21 = sshll.u32 %s1895_s20, 4  ;;  %s2229_s5 = sld [smem:[#allocation19_spill]]  ;;  %s214_s21 = int_to_ptr.vmem [resolvable:$true] %s213_s21 }
  0x12   : > { %p1979_p3 = pnand %p1378_p0, %p200_p2  ;;  %s1896_s25 = smov [#allocation12]  }
  0x13   : > { %s231_s26 = sshll.u32 %s1896_s25, 4  ;;  %s1897_s27 = smov 64   ;;  %s232_s26 = int_to_ptr.vmem [resolvable:$true] %s231_s26 }
  0x14   : > { %s211_s17 = sshll.u32 %s2227_s3, 4  ;;  %p1644_p4 = pneg %p1979_p3  ;;  %s212_s17 = int_to_ptr.hbm [resolvable:$true] %s211_s17 }
  0x15   : > { %s1898_s28 = smov 4   ;;  %s1377_s29 = sadd.s32 4294967294, %s1891_s1  }
  0x16   : > { %p1645_p6 = pnand %p1644_p4, %p59_p1  ;;  %s1993_s30 = sadd.s32 1, %s1891_s1  }
  0x17   : > { %s229_s24 = sshll.u32 %s2229_s5, 4  ;;  %s42_s9 = ssub.s32 %s1891_s1, %s1993_s30  ;;  %s230_s24 = int_to_ptr.hbm [resolvable:$true] %s229_s24 }
  0x18   : > { %1647 = dma.hbm_to_vmem [thread:$0]  (!%p1645_p6), %s212_s17, 6144, %s214_s21, [#allocation11], %s1897_s27, %s1897_s27, %s1898_s28  }
  0x19   : > { %1650 = dma.hbm_to_vmem [thread:$0]  (!%p1645_p6), %s230_s24, 128, %s232_s26, [#allocation11]  }
  0x1a   : > { %s45_s10 = sadd.s32 1, %s1887_s14  ;;  %p43_p7 = scmp.eq.s32.totalorder %s42_s9, 0 }
  0x1b   : > { %p52_p8 = scmp.ne.s32.totalorder %s1887_s14, %s1883_s0  ;;  %p53_p9 = scmp.eq.s32.totalorder %s1891_s1, 0 }
  0x1c   : > { %p58_p10 = scmp.ne.s32.totalorder %s1883_s0, %s1879_s13  ;;  %p187_p13 = scmp.eq.s32.totalorder %s1974_s18, 1 }
  0x1d   : > { %s2004_s11 = scalar_select %p43_p7, %s1887_s14, %s45_s10  }
  0x1e   : > { %p54_p11 = por %p53_p9, %p52_p8  ;;  %p2008_p12 = por %p59_p1, %p58_p10 }
  0x1f   : > { %p193_p0 = scmp.eq.s32.totalorder %s1377_s29, 1  ;;  %p1661_p2 = scmp.lt.s32.totalorder %s1891_s1, 2 }
  0x20   : > { %s248_s15 = sand.u32 1, %s1887_s14   ;;  %p2015_p4 = por %p187_p13, %p52_p8 }
  0x21   : > { %p2019_p6 = por %p193_p0, %p58_p10  ;;  %s1629_s20 = smul.u32 48, %s248_s15 }
  0x22   : > { %s1630_s21 = smul.u32 48, %s1891_s1  ;;  %p2024_p7 = pnand %p1661_p2, %p54_p11 }
  0x23   : > { %s252_s26 = scalar_lea.vmem [#allocation7], %s1629_s20  ;;  %s249_s29 = scalar_lea.sflag [#allocation8], %s248_s15 }
  0x24   : > { %s257_s25 = scalar_lea.hbm %s2217_s2, %s1630_s21  ;;  %s261_s27 = sshll.u32 %s252_s26, 4  ;;  %s262_s27 = int_to_ptr.vmem [resolvable:$true] %s261_s27 }
  0x25   : > { %s259_s28 = sshll.u32 %s257_s25, 4  ;;  %p1793_p9 = pneg %p2024_p7  ;;  %s260_s28 = int_to_ptr.hbm [resolvable:$true] %s259_s28 }
  0x26   : > { %s1789_s9 = sshra.s32 %s260_s28, 4  ;;  %s1796_s23 = scalar_lea.hbm %s2217_s2, 96  ;;  %s1790_s9 = int_to_ptr.hbm [resolvable:$true] %s1789_s9 }
  0x27   : > { %s1791_s10 = scalar_lea.hbm %s1790_s9, 48  ;;  %p1797_p13 = scmp.lt.s32.totalorder %s1790_s9, %s2217_s2 }
  0x28   : > { %p1792_p8 = scmp.ne.s32.totalorder %s1790_s9, %s1791_s10  ;;  %p1798_p0 = scmp.lt.s32.totalorder %s1796_s23, %s1791_s10 }
  0x2a   : > { %p1794_p10 = pnand %p1793_p9, %p1792_p8  ;;  %p1799_p2 = por %p1798_p0, %p1797_p13 }
  0x2c   : > { %p1795_p11 = pneg %p1794_p10 }
  0x2e   : > { %p1800_p5 = pnand %p1799_p2, %p1795_p11 }
  0x30   : > { %1803 = shalt.err (!%p1800_p5)
}
  0x31   : > { %1654 = dma.hbm_to_vmem [thread:$0]  (!%p2024_p7), %s260_s28, 768, %s262_s27, %s249_s29  }
  0x32   : > { %270 = sbr.rel (%p1979_p3) target bundleno = 2500 (0x9c4), region = 44  ;;  %s2044_s15 = sand.u32 (!%p1979_p3), 1, %s1883_s0  }
  0x33   : > { %s1631_s3 = smul.u32 (!%p1979_p3), 48, %s2044_s15  ;;  %s273_s5 = scalar_lea.sflag (!%p1979_p3), [#allocation8], %s2044_s15 }
  0x35   : > { %s2048_s20 = scalar_lea.vmem (!%p1979_p3), [#allocation7], %s1631_s3 }
  0x37   : > { %1866 = dma.done.wait (%p2008_p12), %s273_s5, 768  }
  0x38   : > { %1868 = vsyncadd (%p2008_p12), %s273_s5, 4294966528 }
  0x39   : > { %1870 = dma.done.wait (%p59_p1), [#allocation11], 6272  }
  0x3a   : > { %1872 = vsyncadd (%p59_p1), [#allocation11], 4294961024  ;;  %v1588_v0 = vld [vmem:[#allocation10 + $0x38] sm:$0xff]  ;;  %v1587_v2 = vld [vmem:[#allocation10 + $0x30] sm:$0xff]  ;;  %s2083_s26 = sshll.u32 %s1974_s18, 3 }
  0x3b   : > { %v1596_v1 = vld [vmem:[#allocation10 + $0x78] sm:$0xff]  ;;  %715 = vmatpush.bf16.msra.mxu0 %v1588_v0  ;;  %v1595_v3 = vld [vmem:[#allocation10 + $0x70] sm:$0xff]  ;;  %v1586_v8 = vld [vmem:[#allocation10 + $0x28] sm:$0xff]  ;;  %s805_s27 = sadd.s32 1, %s2083_s26  ;;  %s839_s9 = sadd.s32 2, %s2083_s26 }
  0x3c   : > { %728 = vmatpush.bf16.msra.mxu1 %v1596_v1  ;;  %v1604_v4 = vld [vmem:[#allocation10 + $0xb8] sm:$0xff]  ;;  %v1603_v6 = vld [vmem:[#allocation10 + $0xb0] sm:$0xff]  ;;  %v1594_v9 = vld [vmem:[#allocation10 + $0x68] sm:$0xff]  ;;  %s806_s28 = sld [smem:[#allocation5 + %s805_s27]]  ;;  %s871_s24 = sadd.s32 3, %s2083_s26 }
  0x3d   : > { %v1612_v5 = vld [vmem:[#allocation10 + $0xf8] sm:$0xff]  ;;  %741 = vmatpush.bf16.msra.mxu2 %v1604_v4  ;;  %v1611_v7 = vld [vmem:[#allocation10 + $0xf0] sm:$0xff]  ;;  %v1602_v10 = vld [vmem:[#allocation10 + $0xa8] sm:$0xff]  ;;  %s840_s10 = sld [smem:[#allocation5 + %s839_s9]]  ;;  %s903_s5 = sadd.s32 4, %s2083_s26 }
  0x3e   : > { %754 = vmatpush.bf16.msra.mxu3 %v1612_v5  ;;  %v1610_v11 = vld [vmem:[#allocation10 + $0xe8] sm:$0xff]  ;;  %v1585_v12 = vld [vmem:[#allocation10 + $0x20] sm:$0xff]  ;;  %v1584_v16 = vld [vmem:[#allocation10 + $0x18] sm:$0xff]  ;;  %s872_s21 = sld [smem:[#allocation5 + %s871_s24]]  ;;  %s935_s12 = sadd.s32 5, %s2083_s26 }
  0x3f   : > { %716 = vmatpush.bf16.msra.mxu0 %v1587_v2  ;;  %v1593_v13 = vld [vmem:[#allocation10 + $0x60] sm:$0xff]  ;;  %v1592_v17 = vld [vmem:[#allocation10 + $0x58] sm:$0xff]  ;;  %v1583_v20 = vld [vmem:[#allocation10 + $0x10] sm:$0xff]  ;;  %s936_s22 = sld [smem:[#allocation5 + %s935_s12]]  ;;  %s967_s27 = sadd.s32 6, %s2083_s26 }
  0x40   : > { %729 = vmatpush.bf16.msra.mxu1 %v1595_v3  ;;  %v1601_v14 = vld [vmem:[#allocation10 + $0xa0] sm:$0xff]  ;;  %v1600_v18 = vld [vmem:[#allocation10 + $0x98] sm:$0xff]  ;;  %v1591_v21 = vld [vmem:[#allocation10 + $0x50] sm:$0xff]  ;;  %s999_s9 = sadd.s32 7, %s2083_s26  ;;  %s2131_s26 = sld [smem:[#allocation6 + %s1974_s18]] }
  0x41   : > { %742 = vmatpush.bf16.msra.mxu2 %v1603_v6  ;;  %v1609_v15 = vld [vmem:[#allocation10 + $0xe0] sm:$0xff]  ;;  %v1608_v19 = vld [vmem:[#allocation10 + $0xd8] sm:$0xff]  ;;  %v1599_v22 = vld [vmem:[#allocation10 + $0x90] sm:$0xff] }
  0x42   : > { %755 = vmatpush.bf16.msra.mxu3 %v1611_v7  ;;  %v1607_v23 = vld [vmem:[#allocation10 + $0xd0] sm:$0xff]  ;;  %v1582_v24 = vld [vmem:[#allocation10 + $0x8] sm:$0xff]  ;;  %v1581_v27 = vld [vmem:[#allocation10] sm:$0xff]  ;;  %p807_p1 = scmp.gt.s32.totalorder %s806_s28, 0  ;;  %s968_s28 = sld [smem:[#allocation5 + %s967_s27]] }
  0x43   : > { %717 = vmatpush.bf16.msra.mxu0 %v1586_v8  ;;  %v1590_v25 = vld [vmem:[#allocation10 + $0x48] sm:$0xff]  ;;  %v1589_v29 = vld [vmem:[#allocation10 + $0x40] sm:$0xff]  ;;  %v1620_v32 = vld [vmem:[#allocation10 + $0x138] sm:$0xff]  ;;  %p841_p3 = scmp.gt.s32.totalorder %s840_s10, 0  ;;  %s1000_s10 = sld [smem:[#allocation5 + %s999_s9]] }
  0x44   : > { %730 = vmatpush.bf16.msra.mxu1 %v1594_v9  ;;  %v1598_v26 = vld [vmem:[#allocation10 + $0x88] sm:$0xff]  ;;  %v315_v30 = vld [vmem:[%s2048_s20] sm:$0xff]  ;;  %v1628_v33 = vld [vmem:[#allocation10 + $0x178] sm:$0xff]  ;;  %s835_s29 = scalar_select %p807_p1, 1, 0 }
  0x45   : > { %743 = vmatpush.bf16.msra.mxu2 %v1602_v10  ;;  %v1606_v28 = vld [vmem:[#allocation10 + $0xc8] sm:$0xff]  ;;  %v1597_v34 = vld [vmem:[#allocation10 + $0x80] sm:$0xff]  ;;  %v321_v35 = vpack.c.bf16 %v315_v30, %v315_v30  ;;  %v1619_v40 = vld [vmem:[#allocation10 + $0x130] sm:$0xff]  ;;  %s867_s23 = scalar_select %p841_p3, 1, 0 }
  0x46   : > { %756 = vmatpush.bf16.msra.mxu3 %v1610_v11  ;;  %v316_v31 = vld [vmem:[%s2048_s20 + $0x8] sm:$0xff]  ;;  %v317_v37 = vld [vmem:[%s2048_s20 + $0x10] sm:$0xff]  ;;  %v318_v39 = vld [vmem:[%s2048_s20 + $0x18] sm:$0xff]  ;;  %p873_p5 = scmp.gt.s32.totalorder %s872_s21, 0  ;;  %p937_p7 = scmp.gt.s32.totalorder %s936_s22, 0 }
  0x47   : > { %718 = vmatpush.bf16.msra.mxu0 %v1585_v12  ;;  %v322_v36 = vpack.c.bf16 %v316_v31, %v316_v31  ;;  %v1605_v38 = vld [vmem:[#allocation10 + $0xc0] sm:$0xff]  ;;  %v1627_v41 = vld [vmem:[#allocation10 + $0x170] sm:$0xff]  ;;  %v323_v42 = vpack.c.bf16 %v317_v37, %v317_v37  ;;  %v324_v43 = vpack.c.bf16 %v318_v39, %v318_v39  ;;  %v1618_v44 = vld [vmem:[#allocation10 + $0x128] sm:$0xff]  ;;  %p1072_p10 = scmp.gt.s32.totalorder %s2131_s26, 7  ;;  %p1071_p11 = scmp.eq.s32.totalorder %s2131_s26, 7 }
  0x48   : > { %731 = vmatpush.bf16.msra.mxu1 %v1593_v13  ;;  %v1626_v45 = vld [vmem:[#allocation10 + $0x168] sm:$0xff]  ;;  %v1617_v46 = vld [vmem:[#allocation10 + $0x120] sm:$0xff]  ;;  %v1616_v48 = vld [vmem:[#allocation10 + $0x118] sm:$0xff]  ;;  %v795_v13 = vlaneseq  ;;  %s899_s3 = scalar_select %p873_p5, 1, 0 }
  0x49   : > { %744 = vmatpush.bf16.msra.mxu2 %v1601_v14  ;;  %v1625_v47 = vld [vmem:[#allocation10 + $0x160] sm:$0xff]  ;;  %v1624_v49 = vld [vmem:[#allocation10 + $0x158] sm:$0xff]  ;;  %v1615_v50 = vld [vmem:[#allocation10 + $0x110] sm:$0xff]  ;;  %s963_s25 = scalar_select %p937_p7, 1, 0 }
  0x4a   : > { %757 = vmatpush.bf16.msra.mxu3 %v1609_v15  ;;  %v1623_v51 = vld [vmem:[#allocation10 + $0x150] sm:$0xff]  ;;  %v1614_v52 = vld [vmem:[#allocation10 + $0x108] sm:$0xff]  ;;  %v1613_v54 = vld [vmem:[#allocation10 + $0x100] sm:$0xff]  ;;  %p969_p8 = scmp.gt.s32.totalorder %s968_s28, 0  ;;  %p1001_p9 = scmp.gt.s32.totalorder %s1000_s10, 0 }
  0x4b   : > { %719 = vmatpush.bf16.msra.mxu0 %v1584_v16  ;;  %v1622_v53 = vld [vmem:[#allocation10 + $0x148] sm:$0xff]  ;;  %v1621_v55 = vld [vmem:[#allocation10 + $0x140] sm:$0xff]  ;;  %v1704_v2 = vld [vmem:[%s2219_s4] ss:$0 sm:$0xff]  ;;  %v2067_v16 = vshrl.u32 %v795_v13, 7  ;;  %p1099_p13 = scmp.gt.s32.totalorder %s2131_s26, 6 }
  0x4c   : > { %732 = vmatpush.bf16.msra.mxu1 %v1592_v17  ;;  %v319_v56 = vld [vmem:[%s2048_s20 + $0x20] sm:$0xff]  ;;  %v320_v57 = vld [vmem:[%s2048_s20 + $0x28] sm:$0xff]  ;;  %v2069_v17 = vand.u32 127, %v795_v13  ;;  %s904_s20 = sld [smem:[#allocation5 + %s903_s5]]  ;;  %p1098_p0 = scmp.eq.s32.totalorder %s2131_s26, 6 }
  0x4d   : > { %745 = vmatpush.bf16.msra.mxu2 %v1600_v18  ;;  %v325_v58 = vpack.c.bf16 %v319_v56, %v319_v56  ;;  %v326_v59 = vpack.c.bf16 %v320_v57, %v320_v57  ;;  %v800_v18 = vld [vmem:[%s2221_s6] sm:$0x1]  ;;  %s1077_s5 = scalar_select %p1071_p11, 1, 0 }
  0x4e   : > { %758 = vmatpush.bf16.msra.mxu3 %v1608_v19  ;;  %vm2076_vm0 = vcmp.eq.s32.totalorder %v2069_v17, %v2067_v16  ;;  %p1127_p2 = scmp.gt.s32.totalorder %s2131_s26, 5  ;;  %p1126_p1 = scmp.eq.s32.totalorder %s2131_s26, 5 }
  0x4f   : > { %720 = vmatpush.bf16.msra.mxu0 %v1583_v20  ;;  %p1155_p3 = scmp.gt.s32.totalorder %s2131_s26, 4  ;;  %p1154_p5 = scmp.eq.s32.totalorder %s2131_s26, 4 }
  0x50   : > { %733 = vmatpush.bf16.msra.mxu1 %v1591_v21  ;;  %s1128_s12 = scalar_select %p1127_p2, 1, 0 }
  0x51   : > { %746 = vmatpush.bf16.msra.mxu2 %v1599_v22  ;;  %s1132_s22 = scalar_select %p1126_p1, 1, 0 }
  0x52   : > { %759 = vmatpush.bf16.msra.mxu3 %v1607_v23  ;;  %p905_p12 = scmp.gt.s32.totalorder %s904_s20, 0  ;;  %p1182_p7 = scmp.eq.s32.totalorder %s2131_s26, 3 }
  0x53   : > { %721 = vmatpush.bf16.msra.mxu0 %v1582_v24  ;;  %v2086_v24 = vld [vmem:[#allocation12] sm:$0xff]  ;;  %s1100_s20 = scalar_select %p1099_p13, 1, 0 }
  0x54   : > { %734 = vmatpush.bf16.msra.mxu1 %v1590_v25  ;;  %s931_s19 = scalar_select %p905_p12, 1, 0 }
  0x55   : > { %747 = vmatpush.bf16.msra.mxu2 %v1598_v26  ;;  %s1160_s27 = scalar_select %p1154_p5, 1, 0 }
  0x56   : > { %760 = vmatpush.bf16.msra.mxu3 %v1606_v28  ;;  %p1183_p12 = scmp.gt.s32.totalorder %s2131_s26, 3  ;;  %p1238_p11 = scmp.eq.s32.totalorder %s2131_s26, 1 }
  0x57   : > { %722 = vmatpush.bf16.msra.mxu0 %v1581_v27  ;;  %p1267_p13 = scmp.gt.s32.totalorder %s2131_s26, 0 }
  0x58   : > { %735 = vmatpush.bf16.msra.mxu1 %v1589_v29  ;;  %s1184_s28 = scalar_select %p1183_p12, 1, 0 }
  0x59   : > { %748 = vmatpush.bf16.msra.mxu2 %v1597_v34  ;;  %s1244_s24 = scalar_select %p1238_p11, 1, 0 }
  0x5a   : > { %723 = vmatmul.bf16.vlgmr.msra.gmra.mxu0 %v321_v35  ;;  %761 = vmatpush.bf16.msra.mxu3 %v1605_v38  ;;  %s1268_s21 = scalar_select %p1267_p13, 1, 0 }
  0x5b   : > { %767 = vmatpush.bf16.msrb.mxu0 %v1620_v32  ;;  %736 = vmatmul.bf16.vlgmr.msra.gmra.mxu1 %v322_v36  ;;  %v836_v32 = vstv %s835_s29  ;;  %s995_s29 = scalar_select %p969_p8, 1, 0 }
  0x5c   : > { %780 = vmatpush.bf16.msrb.mxu1 %v1628_v33  ;;  %749 = vmatmul.bf16.vlgmr.msra.gmra.mxu2 %v323_v42  ;;  %vm837_vm1 = vcmp.eq.s32.totalorder %v836_v32, 1  ;;  %p1211_p8 = scmp.gt.s32.totalorder %s2131_s26, 2 }
  0x5d   : > { %762 = vmatmul.bf16.vlgmr.msra.gmra.mxu3 %v324_v43 }
  0x5e   : > { %s1212_s9 = scalar_select %p1211_p8, 1, 0 }
  0x5f   : > { %768 = vmatpush.bf16.msrb.mxu0 %v1619_v40 }
  0x60   : > { %781 = vmatpush.bf16.msrb.mxu1 %v1627_v41 }
  0x63   : > { %769 = vmatpush.bf16.msrb.mxu0 %v1618_v44 }
  0x64   : > { %782 = vmatpush.bf16.msrb.mxu1 %v1626_v45 }
  0x67   : > { %770 = vmatpush.bf16.msrb.mxu0 %v1617_v46 }
  0x68   : > { %783 = vmatpush.bf16.msrb.mxu1 %v1625_v47 }
  0x6b   : > { %771 = vmatpush.bf16.msrb.mxu0 %v1616_v48 }
  0x6c   : > { %784 = vmatpush.bf16.msrb.mxu1 %v1624_v49 }
  0x6f   : > { %772 = vmatpush.bf16.msrb.mxu0 %v1615_v50 }
  0x70   : > { %785 = vmatpush.bf16.msrb.mxu1 %v1623_v51 }
  0x73   : > { %773 = vmatpush.bf16.msrb.mxu0 %v1614_v52 }
  0x74   : > { %786 = vmatpush.bf16.msrb.mxu1 %v1622_v53  ;;  %v868_v53 = vstv %s867_s23  ;;  %s1027_s23 = scalar_select %p1001_p9, 1, 0 }
  0x75   : > { %vm869_vm6 = vcmp.eq.s32.totalorder %v868_v53, 1  ;;  %p1210_p9 = scmp.eq.s32.totalorder %s2131_s26, 2 }
  0x77   : > { %774 = vmatpush.bf16.msrb.mxu0 %v1613_v54  ;;  %s1216_s10 = scalar_select %p1210_p9, 1, 0 }
  0x78   : > { %787 = vmatpush.bf16.msrb.mxu1 %v1621_v55 }
  0x7a   : > { %775 = vmatmul.bf16.vlgmr.msrb.gmra.mxu0 %v325_v58 }
  0x7b   : > { %788 = vmatmul.bf16.vlgmr.msrb.gmra.mxu1 %v326_v59 }
  0xd7   : > { %v724_v60 = vpop.f32.mrf.mxu0 }
  0xd8   : > { %v737_v61 = vpop.f32.mrf.mxu1  ;;  %v725_v3 = vadd.f32 %v1704_v2, %v724_v60 }
  0xda   : > { %v738_v6 = vadd.f32 %v737_v61, %v725_v3 }
  0xdf   : > { %v726_v62 = vpop.f32.mrf.mxu0  ;;  %v750_v0 = vpop.f32.mrf.mxu2 }
  0xe0   : > { %v739_v63 = vpop.f32.mrf.mxu1  ;;  %v763_v1 = vpop.f32.mrf.mxu3  ;;  %v751_v7 = vadd.f32 %v750_v0, %v738_v6 }
  0xe2   : > { %v764_v8 = vadd.f32 %v763_v1, %v751_v7 }
  0xe7   : > { %v752_v4 = vpop.f32.mrf.mxu2 }
  0xe8   : > { %v765_v5 = vpop.f32.mrf.mxu3 }
  0xf7   : > { %v776_v9 = vpop.f32.mrf.mxu0 }
  0xf8   : > { %v789_v10 = vpop.f32.mrf.mxu1  ;;  %v777_v11 = vadd.f32 %v776_v9, %v764_v8 }
  0xfa   : > { %v790_v12 = vadd.f32 %v789_v10, %v777_v11  ;;  %v900_v10 = vstv %s899_s3  ;;  %s1073_s3 = scalar_select %p1072_p10, 1, 0 }
  0xfb   : > { %vm901_vm11 = vcmp.eq.s32.totalorder %v900_v10, 1  ;;  %p1239_p10 = scmp.gt.s32.totalorder %s2131_s26, 1 }
  0xfc   : > { %793 = vst [vmem:[#allocation2] sm:$0xff] %v790_v12 }
  0xff   : > { %v778_v14 = vpop.f32.mrf.mxu0 }
 0x100   : > { %v791_v15 = vpop.f32.mrf.mxu1 }
 0x103   : > { %v801_v19 = vld [vmem:[#allocation2] sm:$0x1]  ;;  %v833_v34 = vld [vmem:[#allocation2 + $0x1] sm:$0x1]  ;;  %v865_v55 = vld [vmem:[#allocation2 + $0x2] sm:$0x1] }
 0x104   : > { %v802_v20 = vadd.f32 %v801_v19, %v800_v18  ;;  %v897_v12 = vld [vmem:[#allocation2 + $0x3] sm:$0x1] }
 0x106   : > { %v809_v22 = vperm.slane %v802_v20, 0 }
 0x108   : > { %v811_v23 = vsel %vm2076_vm0, %v809_v22, -1e+30 }
 0x109   : > { %812 = vmax.xlane.f32.xlu0 %v811_v23 }
 0x17c   : > { %v813_v25 = vpop.xlane.xlu0 %812 }
 0x17d   : > { %v814_v26 = vadd.f32 %v813_v25, %v2086_v24 }
 0x17f   : > { %v815_v27 = vrot.slane %v814_v26, 4 }
 0x181   : > { %v816_v28 = vmax.f32 %v814_v26, %v815_v27 }
 0x183   : > { %v817_v29 = vrot.slane %v816_v28, 2 }
 0x185   : > { %v818_v30 = vmax.f32 %v816_v28, %v817_v29 }
 0x187   : > { %v819_v31 = vrot.slane %v818_v30, 1 }
 0x189   : > { %v820_v33 = vmax.f32 %v818_v30, %v819_v31 }
 0x18b   : > { %vm821_vm2 = vcmp.eq.f32.partialorder %v814_v26, %v820_v33  ;;  %v834_v35 = vadd.f32 %v833_v34, %v820_v33 }
 0x18c   : > { %v822_v36 = vsel %vm821_vm2, %v2067_v16, 8 }
 0x18d   : > { %v823_v37 = vrot.slane %v822_v36, 4  ;;  %v838_v38 = vsel %vm837_vm1, %v834_v35, %v802_v20  ;;  %v932_v35 = vstv %s931_s19  ;;  %s1104_s19 = scalar_select %p1098_p0, 1, 0 }
 0x18e   : > { %v842_v39 = vperm.slane %v838_v38, 0  ;;  %vm933_vm1 = vcmp.eq.s32.totalorder %v932_v35, 1  ;;  %p1266_p0 = scmp.eq.s32.totalorder %s2131_s26, 0 }
 0x18f   : > { %vm824_vm3 = vcmp.lt.s32.totalorder %v822_v36, %v823_v37 }
 0x190   : > { %v825_v40 = vsel %vm824_vm3, %v822_v36, %v823_v37  ;;  %v843_v41 = vsel %vm2076_vm0, %v842_v39, -1e+30  ;;  %v929_v37 = vld [vmem:[#allocation2 + $0x4] sm:$0x1] }
 0x191   : > { %v826_v42 = vrot.slane %v825_v40, 2  ;;  %844 = vmax.xlane.f32.xlu0 %v843_v41 }
 0x193   : > { %vm827_vm4 = vcmp.lt.s32.totalorder %v825_v40, %v826_v42 }
 0x194   : > { %v828_v43 = vsel %vm827_vm4, %v825_v40, %v826_v42 }
 0x195   : > { %v829_v44 = vrot.slane %v828_v43, 1 }
 0x197   : > { %vm830_vm5 = vcmp.lt.s32.totalorder %v828_v43, %v829_v44 }
 0x198   : > { %v831_v45 = vsel %vm830_vm5, %v828_v43, %v829_v44 }
 0x199   : > { %832 = vst [vmem:[#allocation3 + $0x1] sm:$0x1] %v831_v45 }
 0x204   : > { %v845_v46 = vpop.xlane.xlu0 %844 }
 0x205   : > { %v846_v47 = vadd.f32 %v845_v46, %v2086_v24 }
 0x207   : > { %v847_v48 = vrot.slane %v846_v47, 4 }
 0x209   : > { %v848_v49 = vmax.f32 %v846_v47, %v847_v48 }
 0x20b   : > { %v849_v50 = vrot.slane %v848_v49, 2 }
 0x20d   : > { %v850_v51 = vmax.f32 %v848_v49, %v849_v50 }
 0x20f   : > { %v851_v52 = vrot.slane %v850_v51, 1 }
 0x211   : > { %v852_v54 = vmax.f32 %v850_v51, %v851_v52 }
 0x213   : > { %vm853_vm7 = vcmp.eq.f32.partialorder %v846_v47, %v852_v54  ;;  %v866_v56 = vadd.f32 %v865_v55, %v852_v54 }
 0x214   : > { %v854_v57 = vsel %vm853_vm7, %v2067_v16, 8 }
 0x215   : > { %v855_v58 = vrot.slane %v854_v57, 4  ;;  %v870_v59 = vsel %vm869_vm6, %v866_v56, %v838_v38  ;;  %v964_v56 = vstv %s963_s25  ;;  %s1156_s25 = scalar_select %p1155_p3, 1, 0 }
 0x216   : > { %v874_v60 = vperm.slane %v870_v59, 0  ;;  %vm965_vm6 = vcmp.eq.s32.totalorder %v964_v56, 1 }
 0x217   : > { %vm856_vm8 = vcmp.lt.s32.totalorder %v854_v57, %v855_v58 }
 0x218   : > { %v857_v61 = vsel %vm856_vm8, %v854_v57, %v855_v58  ;;  %v875_v62 = vsel %vm2076_vm0, %v874_v60, -1e+30  ;;  %v961_v58 = vld [vmem:[#allocation2 + $0x5] sm:$0x1] }
 0x219   : > { %v858_v63 = vrot.slane %v857_v61, 2  ;;  %876 = vmax.xlane.f32.xlu1 %v875_v62 }
 0x21b   : > { %vm859_vm9 = vcmp.lt.s32.totalorder %v857_v61, %v858_v63 }
 0x21c   : > { %v860_v0 = vsel %vm859_vm9, %v857_v61, %v858_v63 }
 0x21d   : > { %v861_v1 = vrot.slane %v860_v0, 1 }
 0x21f   : > { %vm862_vm10 = vcmp.lt.s32.totalorder %v860_v0, %v861_v1 }
 0x220   : > { %v863_v2 = vsel %vm862_vm10, %v860_v0, %v861_v1 }
 0x221   : > { %864 = vst [vmem:[#allocation3 + $0x2] sm:$0x1] %v863_v2 }
 0x28c   : > { %v877_v3 = vpop.xlane.xlu1 %876 }
 0x28d   : > { %v878_v4 = vadd.f32 %v877_v3, %v2086_v24 }
 0x28f   : > { %v879_v5 = vrot.slane %v878_v4, 4 }
 0x291   : > { %v880_v6 = vmax.f32 %v878_v4, %v879_v5 }
 0x293   : > { %v881_v7 = vrot.slane %v880_v6, 2 }
 0x295   : > { %v882_v8 = vmax.f32 %v880_v6, %v881_v7 }
 0x297   : > { %v883_v9 = vrot.slane %v882_v8, 1 }
 0x299   : > { %v884_v11 = vmax.f32 %v882_v8, %v883_v9 }
 0x29b   : > { %vm885_vm12 = vcmp.eq.f32.partialorder %v878_v4, %v884_v11  ;;  %v898_v13 = vadd.f32 %v897_v12, %v884_v11 }
 0x29c   : > { %v886_v14 = vsel %vm885_vm12, %v2067_v16, 8 }
 0x29d   : > { %v887_v15 = vrot.slane %v886_v14, 4  ;;  %v902_v18 = vsel %vm901_vm11, %v898_v13, %v870_v59  ;;  %v996_v13 = vstv %s995_s29  ;;  %s1188_s29 = scalar_select %p1182_p7, 1, 0 }
 0x29e   : > { %v906_v19 = vperm.slane %v902_v18, 0  ;;  %vm997_vm11 = vcmp.eq.s32.totalorder %v996_v13, 1 }
 0x29f   : > { %vm888_vm13 = vcmp.lt.s32.totalorder %v886_v14, %v887_v15 }
 0x2a0   : > { %v889_v20 = vsel %vm888_vm13, %v886_v14, %v887_v15  ;;  %v907_v22 = vsel %vm2076_vm0, %v906_v19, -1e+30  ;;  %v993_v15 = vld [vmem:[#allocation2 + $0x6] sm:$0x1] }
 0x2a1   : > { %v890_v23 = vrot.slane %v889_v20, 2  ;;  %908 = vmax.xlane.f32.xlu1 %v907_v22 }
 0x2a3   : > { %vm891_vm14 = vcmp.lt.s32.totalorder %v889_v20, %v890_v23 }
 0x2a4   : > { %v892_v25 = vsel %vm891_vm14, %v889_v20, %v890_v23 }
 0x2a5   : > { %v893_v26 = vrot.slane %v892_v25, 1 }
 0x2a7   : > { %vm894_vm15 = vcmp.lt.s32.totalorder %v892_v25, %v893_v26 }
 0x2a8   : > { %v895_v27 = vsel %vm894_vm15, %v892_v25, %v893_v26 }
 0x2a9   : > { %896 = vst [vmem:[#allocation3 + $0x3] sm:$0x1] %v895_v27 }
 0x314   : > { %v909_v28 = vpop.xlane.xlu1 %908 }
 0x315   : > { %v910_v29 = vadd.f32 %v909_v28, %v2086_v24 }
 0x317   : > { %v911_v30 = vrot.slane %v910_v29, 4 }
 0x319   : > { %v912_v31 = vmax.f32 %v910_v29, %v911_v30 }
 0x31b   : > { %v913_v32 = vrot.slane %v912_v31, 2 }
 0x31d   : > { %v914_v33 = vmax.f32 %v912_v31, %v913_v32 }
 0x31f   : > { %v915_v34 = vrot.slane %v914_v33, 1 }
 0x321   : > { %v916_v36 = vmax.f32 %v914_v33, %v915_v34 }
 0x323   : > { %vm917_vm2 = vcmp.eq.f32.partialorder %v910_v29, %v916_v36  ;;  %v930_v38 = vadd.f32 %v929_v37, %v916_v36  ;;  %v1028_v37 = vstv %s1027_s23  ;;  %s1240_s23 = scalar_select %p1239_p10, 1, 0 }
 0x324   : > { %v918_v39 = vsel %vm917_vm2, %v2067_v16, 8  ;;  %vm1033_vm2 = vcmask 1040384  }
 0x325   : > { %v919_v40 = vrot.slane %v918_v39, 4  ;;  %v934_v41 = vsel %vm933_vm1, %v930_v38, %v902_v18 }
 0x326   : > { %v938_v42 = vperm.slane %v934_v41, 0 }
 0x327   : > { %vm920_vm3 = vcmp.lt.s32.totalorder %v918_v39, %v919_v40 }
 0x328   : > { %v921_v43 = vsel %vm920_vm3, %v918_v39, %v919_v40  ;;  %v939_v44 = vsel %vm2076_vm0, %v938_v42, -1e+30  ;;  %v1025_v39 = vld [vmem:[#allocation2 + $0x7] sm:$0x1] }
 0x329   : > { %v922_v45 = vrot.slane %v921_v43, 2  ;;  %940 = vmax.xlane.f32.xlu2 %v939_v44 }
 0x32b   : > { %vm923_vm4 = vcmp.lt.s32.totalorder %v921_v43, %v922_v45 }
 0x32c   : > { %v924_v46 = vsel %vm923_vm4, %v921_v43, %v922_v45 }
 0x32d   : > { %v925_v47 = vrot.slane %v924_v46, 1 }
 0x32f   : > { %vm926_vm5 = vcmp.lt.s32.totalorder %v924_v46, %v925_v47 }
 0x330   : > { %v927_v48 = vsel %vm926_vm5, %v924_v46, %v925_v47 }
 0x331   : > { %928 = vst [vmem:[#allocation3 + $0x4] sm:$0x1] %v927_v48 }
 0x39c   : > { %v941_v49 = vpop.xlane.xlu2 %940 }
 0x39d   : > { %v942_v50 = vadd.f32 %v941_v49, %v2086_v24 }
 0x39f   : > { %v943_v51 = vrot.slane %v942_v50, 4 }
 0x3a1   : > { %v944_v52 = vmax.f32 %v942_v50, %v943_v51 }
 0x3a3   : > { %v945_v53 = vrot.slane %v944_v52, 2 }
 0x3a5   : > { %v946_v54 = vmax.f32 %v944_v52, %v945_v53 }
 0x3a7   : > { %v947_v55 = vrot.slane %v946_v54, 1 }
 0x3a9   : > { %v948_v57 = vmax.f32 %v946_v54, %v947_v55 }
 0x3ab   : > { %vm949_vm7 = vcmp.eq.f32.partialorder %v942_v50, %v948_v57  ;;  %v962_v59 = vadd.f32 %v961_v58, %v948_v57 }
 0x3ac   : > { %v950_v60 = vsel %vm949_vm7, %v2067_v16, 8 }
 0x3ad   : > { %v951_v61 = vrot.slane %v950_v60, 4  ;;  %v966_v62 = vsel %vm965_vm6, %v962_v59, %v934_v41  ;;  %v1031_v41 = vld [vmem:[%s2222_s7] sm:$0x1]  ;;  %vm1056_vm6 = vcmp.eq.s32.totalorder %v2069_v17, 0 }
 0x3ae   : > { %v970_v63 = vperm.slane %v966_v62, 0 }
 0x3af   : > { %vm952_vm8 = vcmp.lt.s32.totalorder %v950_v60, %v951_v61 }
 0x3b0   : > { %v953_v0 = vsel %vm952_vm8, %v950_v60, %v951_v61  ;;  %v971_v1 = vsel %vm2076_vm0, %v970_v63, -1e+30 }
 0x3b1   : > { %v954_v2 = vrot.slane %v953_v0, 2  ;;  %972 = vmax.xlane.f32.xlu2 %v971_v1 }
 0x3b3   : > { %vm955_vm9 = vcmp.lt.s32.totalorder %v953_v0, %v954_v2 }
 0x3b4   : > { %v956_v3 = vsel %vm955_vm9, %v953_v0, %v954_v2 }
 0x3b5   : > { %v957_v4 = vrot.slane %v956_v3, 1 }
 0x3b7   : > { %vm958_vm10 = vcmp.lt.s32.totalorder %v956_v3, %v957_v4 }
 0x3b8   : > { %v959_v5 = vsel %vm958_vm10, %v956_v3, %v957_v4 }
 0x3b9   : > { %960 = vst [vmem:[#allocation3 + $0x5] sm:$0x1] %v959_v5 }
 0x424   : > { %v973_v6 = vpop.xlane.xlu2 %972 }
 0x425   : > { %v974_v7 = vadd.f32 %v973_v6, %v2086_v24 }
 0x427   : > { %v975_v8 = vrot.slane %v974_v7, 4 }
 0x429   : > { %v976_v9 = vmax.f32 %v974_v7, %v975_v8 }
 0x42b   : > { %v977_v10 = vrot.slane %v976_v9, 2 }
 0x42d   : > { %v978_v11 = vmax.f32 %v976_v9, %v977_v10  ;;  %v1078_v9 = vstv %s1077_s5 }
 0x42e   : > { %vm1079_vm10 = vcmp.eq.s32.totalorder %v1078_v9, 1 }
 0x42f   : > { %v979_v12 = vrot.slane %v978_v11, 1 }
 0x431   : > { %v980_v14 = vmax.f32 %v978_v11, %v979_v12 }
 0x433   : > { %vm981_vm12 = vcmp.eq.f32.partialorder %v974_v7, %v980_v14  ;;  %v994_v18 = vadd.f32 %v993_v15, %v980_v14  ;;  %v1074_v7 = vstv %s1073_s3  ;;  %s1272_s3 = scalar_select %p1266_p0, 1, 0 }
 0x434   : > { %v982_v19 = vsel %vm981_vm12, %v2067_v16, 8  ;;  %vm1075_vm9 = vcmp.eq.s32.totalorder %v1074_v7, 1 }
 0x435   : > { %v983_v20 = vrot.slane %v982_v19, 4  ;;  %v998_v22 = vsel %vm997_vm11, %v994_v18, %v966_v62 }
 0x436   : > { %v1002_v23 = vperm.slane %v998_v22, 0 }
 0x437   : > { %vm984_vm13 = vcmp.lt.s32.totalorder %v982_v19, %v983_v20 }
 0x438   : > { %v985_v25 = vsel %vm984_vm13, %v982_v19, %v983_v20  ;;  %v1003_v26 = vsel %vm2076_vm0, %v1002_v23, -1e+30  ;;  %vm1029_vm0 = vcmp.eq.s32.totalorder %v1028_v37, 1  ;;  %vm1081_vm13 = vcmp.eq.s32.totalorder %v2069_v17, 7 }
 0x439   : > { %v986_v27 = vrot.slane %v985_v25, 2  ;;  %1004 = vmax.xlane.f32.xlu0 %v1003_v26 }
 0x43b   : > { %vm987_vm14 = vcmp.lt.s32.totalorder %v985_v25, %v986_v27 }
 0x43c   : > { %v988_v28 = vsel %vm987_vm14, %v985_v25, %v986_v27 }
 0x43d   : > { %v989_v29 = vrot.slane %v988_v28, 1 }
 0x43f   : > { %vm990_vm15 = vcmp.lt.s32.totalorder %v988_v28, %v989_v29 }
 0x440   : > { %v991_v30 = vsel %vm990_vm15, %v988_v28, %v989_v29  ;;  %vm1108_vm15 = vcmp.eq.s32.totalorder %v2069_v17, 6 }
 0x441   : > { %992 = vst [vmem:[#allocation3 + $0x6] sm:$0x1] %v991_v30  ;;  %v1101_v30 = vstv %s1100_s20 }
 0x442   : > { %vm1102_vm12 = vcmp.eq.s32.totalorder %v1101_v30, 1 }
 0x4ac   : > { %v1005_v31 = vpop.xlane.xlu0 %1004 }
 0x4ad   : > { %v1006_v32 = vadd.f32 %v1005_v31, %v2086_v24  ;;  %v1105_v31 = vstv %s1104_s19  ;;  %s1288_s19 = scalar_lea.hbm %s2223_s8, %s1974_s18  ;;  %s1280_s18 = scalar_lea.sflag [#allocation9], %s2044_s15 }
 0x4ae   : > { %vm1106_vm14 = vcmp.eq.s32.totalorder %v1105_v31, 1  ;;  %v1194_v31 = vld [vmem:[#allocation3 + $0x3] sm:$0x1] }
 0x4af   : > { %v1007_v33 = vrot.slane %v1006_v32, 4 }
 0x4b1   : > { %v1008_v34 = vmax.f32 %v1006_v32, %v1007_v33 }
 0x4b3   : > { %v1009_v35 = vrot.slane %v1008_v34, 2 }
 0x4b5   : > { %v1010_v21 = vmax.f32 %v1008_v34, %v1009_v35 }
 0x4b7   : > { %v1011_v36 = vrot.slane %v1010_v21, 1 }
 0x4b9   : > { %v1012_v38 = vmax.f32 %v1010_v21, %v1011_v36 }
 0x4bb   : > { %vm1013_vm1 = vcmp.eq.f32.partialorder %v1006_v32, %v1012_v38  ;;  %v1026_v40 = vadd.f32 %v1025_v39, %v1012_v38  ;;  %v1110_v38 = vld [vmem:[#allocation3 + $0x6] sm:$0x1] }
 0x4bc   : > { %v1014_v42 = vsel %vm1013_vm1, %v2067_v16, 8 }
 0x4bd   : > { %v1015_v24 = vrot.slane %v1014_v42, 4  ;;  %v1030_v43 = vsel %vm1029_vm0, %v1026_v40, %v998_v22 }
 0x4be   : > { %v1032_v44 = vadd.f32 %v1031_v41, %v1030_v43 }
 0x4bf   : > { %vm1016_vm3 = vcmp.lt.s32.totalorder %v1014_v42, %v1015_v24 }
 0x4c0   : > { %v1017_v45 = vsel %vm1016_vm3, %v1014_v42, %v1015_v24  ;;  %v1034_v46 = vsel %vm1033_vm2, %v1032_v44, -inf }
 0x4c1   : > { %v1018_v47 = vrot.slane %v1017_v45, 2  ;;  %1035 = vmax.xlane.f32.xlu1 %v1034_v46 }
 0x4c3   : > { %vm1019_vm4 = vcmp.lt.s32.totalorder %v1017_v45, %v1018_v47 }
 0x4c4   : > { %v1020_v48 = vsel %vm1019_vm4, %v1017_v45, %v1018_v47  ;;  %v1129_v47 = vstv %s1128_s12  ;;  %vm1136_vm4 = vcmp.eq.s32.totalorder %v2069_v17, 5  ;;  %s314_s12 = scalar_lea.vmem [#allocation13], %s2044_s15 }
 0x4c5   : > { %v1021_v49 = vrot.slane %v1020_v48, 1  ;;  %vm1130_vm1 = vcmp.eq.s32.totalorder %v1129_v47, 1  ;;  %v1222_v47 = vld [vmem:[#allocation3 + $0x2] sm:$0x1]  ;;  %s1290_s26 = sshll.u32 %s314_s12, 4  ;;  %s1291_s26 = int_to_ptr.vmem [resolvable:$true] %s1290_s26 }
 0x4c7   : > { %vm1022_vm5 = vcmp.lt.s32.totalorder %v1020_v48, %v1021_v49 }
 0x4c8   : > { %v1023_v50 = vsel %vm1022_vm5, %v1020_v48, %v1021_v49  ;;  %v1133_v48 = vstv %s1132_s22  ;;  %s1292_s22 = sshll.u32 %s1288_s19, 4  ;;  %s1293_s22 = int_to_ptr.hbm [resolvable:$true] %s1292_s22 }
 0x4c9   : > { %1024 = vst [vmem:[#allocation3 + $0x7] sm:$0x1] %v1023_v50  ;;  %vm1134_vm3 = vcmp.eq.s32.totalorder %v1133_v48, 1 }
 0x4d0   : > { %v1055_v51 = vld [vmem:[#allocation3 + $0x7] sm:$0x1] }
 0x4d1   : > { %v1057_v16 = vsel %vm1056_vm6, %v1055_v51, 0 }
 0x4d2   : > { %v1058_v52 = vsel %vm1033_vm2, %v1057_v16, 0 }
 0x4d3   : > { %v1060_v53 = vshrl.u32 %v1058_v52, 16  ;;  %v1059_v54 = vand.u32 65535, %v1058_v52 }
 0x4d5   : > { %v1062_v55 = vcvt.s32.f32 %v1060_v53  ;;  %v1061_v56 = vcvt.s32.f32 %v1059_v54  ;;  %v1138_v54 = vld [vmem:[#allocation3 + $0x5] sm:$0x1] }
 0x4d7   : > { %1065 = vadd.xlane.f32.xlu0 %v1062_v55  ;;  %1063 = vadd.xlane.f32.xlu1 %v1061_v56 }
 0x534   : > { %v1036_v57 = vpop.xlane.xlu1 %1035 }
 0x535   : > { %vm1037_vm7 = vcmp.eq.f32.partialorder %v1032_v44, %v1036_v57 }
 0x536   : > { %v1038_v58 = vsel %vm1037_vm7, %v2069_v17, 128 }
 0x537   : > { %v1039_v59 = vsel %vm1033_vm2, %v1038_v58, 2147483647 }
 0x538   : > { %v1041_v60 = vshra.s32 %v1039_v59, 16  ;;  %v1040_v62 = vand.u32 65535, %v1039_v59 }
 0x53a   : > { %v1043_v61 = vcvt.s32.f32 %v1041_v60  ;;  %v1042_v0 = vcvt.s32.f32 %v1040_v62 }
 0x53c   : > { %1044 = vmin.xlane.f32.xlu2 %v1043_v61 }
 0x54a   : > { %v1066_v2 = vpop.xlane.xlu0 %1065  ;;  %v1064_v4 = vpop.xlane.xlu1 %1063 }
 0x54b   : > { %v1068_v3 = vcvt.f32.s32 %v1066_v2  ;;  %v1067_v8 = vcvt.f32.s32 %v1064_v4 }
 0x54d   : > { %v1069_v5 = vshll.u32 %v1068_v3, 16 }
 0x54f   : > { %v1070_v10 = vadd.s32 %v1069_v5, %v1067_v8  ;;  %v1166_v8 = vld [vmem:[#allocation3 + $0x4] sm:$0x1] }
 0x551   : > { %v1076_v15 = vsel %vm1075_vm9, %v1070_v10, 0  ;;  %vm1164_vm9 = vcmp.eq.s32.totalorder %v2069_v17, 4 }
 0x5af   : > { %v1045_v63 = vpop.xlane.xlu2 %1044 }
 0x5b0   : > { %vm1046_vm8 = vcmp.eq.f32.partialorder %v1043_v61, %v1045_v63  ;;  %v1051_v6 = vcvt.f32.s32 %v1045_v63 }
 0x5b1   : > { %v1047_v1 = vsel %vm1046_vm8, %v1042_v0, inf  ;;  %v1157_v0 = vstv %s1156_s25  ;;  %s1833_s25 = sshra.s32 %s1293_s22, 4  ;;  %s1834_s25 = int_to_ptr.hbm [resolvable:$true] %s1833_s25 }
 0x5b2   : > { %1048 = vmin.xlane.f32.xlu2 %v1047_v1  ;;  %v1052_v12 = vshll.u32 %v1051_v6, 16  ;;  %v1161_v1 = vstv %s1160_s27  ;;  %vm1158_vm7 = vcmp.eq.s32.totalorder %v1157_v0, 1  ;;  %v1250_v0 = vld [vmem:[#allocation3 + $0x1] sm:$0x1]  ;;  %s1835_s27 = scalar_lea.hbm %s1834_s25, 1  ;;  %p1840_p5 = scmp.lt.s32.totalorder %s1834_s25, %s2223_s8 }
 0x5b3   : > { %vm1162_vm8 = vcmp.eq.s32.totalorder %v1161_v1, 1  ;;  %p1836_p2 = scmp.ne.s32.totalorder %s1834_s25, %s1835_s27 }
 0x5b5   : > { %p1837_p1 = pnand %p1836_p2, %p2015_p4 }
 0x5b7   : > { %p1838_p3 = pneg %p1837_p1 }
 0x625   : > { %v1049_v11 = vpop.xlane.xlu2 %1048 }
 0x626   : > { %v1050_v13 = vcvt.f32.s32 %v1049_v11 }
 0x628   : > { %v2135_v14 = vadd.s32 %v1052_v12, %v1050_v13 }
 0x62a   : > { %v1080_v18 = vsel %vm1079_vm10, %v2135_v14, %v1076_v15 }
 0x62b   : > { %vm1083_vm11 = vcmp.eq.s32.totalorder %v2069_v17, %v1080_v18  ;;  %v1082_v21 = vsel %vm1081_vm13, %v1080_v18, 0  ;;  %vm1192_vm13 = vcmp.eq.s32.totalorder %v2069_v17, 3 }
 0x62c   : > { %v1084_v19 = vsel %vm1083_vm11, %v1055_v51, 0 }
 0x62d   : > { %v1085_v20 = vsel %vm1033_vm2, %v1084_v19, 0 }
 0x62e   : > { %v1087_v22 = vshrl.u32 %v1085_v20, 16  ;;  %v1086_v23 = vand.u32 65535, %v1085_v20 }
 0x630   : > { %v1089_v25 = vcvt.s32.f32 %v1087_v22  ;;  %v1088_v26 = vcvt.s32.f32 %v1086_v23  ;;  %v1185_v22 = vstv %s1184_s28  ;;  %v1189_v23 = vstv %s1188_s29 }
 0x631   : > { %vm1186_vm11 = vcmp.eq.s32.totalorder %v1185_v22, 1 }
 0x632   : > { %1092 = vadd.xlane.f32.xlu0 %v1089_v25  ;;  %1090 = vadd.xlane.f32.xlu1 %v1088_v26 }
 0x6a5   : > { %v1093_v27 = vpop.xlane.xlu0 %1092  ;;  %v1091_v28 = vpop.xlane.xlu1 %1090 }
 0x6a6   : > { %v1095_v29 = vcvt.f32.s32 %v1093_v27  ;;  %v1094_v33 = vcvt.f32.s32 %v1091_v28 }
 0x6a8   : > { %v1096_v32 = vshll.u32 %v1095_v29, 16 }
 0x6aa   : > { %v1097_v34 = vadd.s32 %v1096_v32, %v1094_v33 }
 0x6ac   : > { %v1103_v35 = vsel %vm1102_vm12, %v1097_v34, 0  ;;  %vm1190_vm12 = vcmp.eq.s32.totalorder %v1189_v23, 1 }
 0x6ad   : > { %v1107_v36 = vsel %vm1106_vm14, %v2135_v14, %v1103_v35 }
 0x6ae   : > { %v1109_v37 = vsel %vm1108_vm15, %v1107_v36, %v1082_v21  ;;  %vm1111_vm0 = vcmp.eq.s32.totalorder %v2069_v17, %v1107_v36 }
 0x6af   : > { %v1112_v39 = vsel %vm1111_vm0, %v1110_v38, 0 }
 0x6b0   : > { %v1113_v40 = vsel %vm1033_vm2, %v1112_v39, 0 }
 0x6b1   : > { %v1115_v41 = vshrl.u32 %v1113_v40, 16  ;;  %v1114_v42 = vand.u32 65535, %v1113_v40  ;;  %v1213_v40 = vstv %s1212_s9  ;;  %s1839_s9 = scalar_lea.hbm %s2223_s8, 2 }
 0x6b2   : > { %vm1214_vm15 = vcmp.eq.s32.totalorder %v1213_v40, 1  ;;  %p1841_p12 = scmp.lt.s32.totalorder %s1839_s9, %s1835_s27 }
 0x6b3   : > { %v1117_v24 = vcvt.s32.f32 %v1115_v41  ;;  %v1116_v43 = vcvt.s32.f32 %v1114_v42  ;;  %v1217_v41 = vstv %s1216_s10 }
 0x6b4   : > { %vm1218_vm0 = vcmp.eq.s32.totalorder %v1217_v41, 1  ;;  %p1842_p7 = por %p1841_p12, %p1840_p5 }
 0x6b5   : > { %1120 = vadd.xlane.f32.xlu2 %v1117_v24  ;;  %1118 = vadd.xlane.f32.xlu0 %v1116_v43 }
 0x6b6   : > { %p1843_p8 = pnand %p1842_p7, %p1838_p3 }
 0x728   : > { %v1121_v44 = vpop.xlane.xlu2 %1120  ;;  %v1119_v45 = vpop.xlane.xlu0 %1118 }
 0x729   : > { %v1123_v46 = vcvt.f32.s32 %v1121_v44  ;;  %v1122_v50 = vcvt.f32.s32 %v1119_v45 }
 0x72b   : > { %v1124_v49 = vshll.u32 %v1123_v46, 16 }
 0x72d   : > { %v1125_v51 = vadd.s32 %v1124_v49, %v1122_v50 }
 0x72f   : > { %v1131_v16 = vsel %vm1130_vm1, %v1125_v51, 0  ;;  %vm1220_vm1 = vcmp.eq.s32.totalorder %v2069_v17, 2 }
 0x730   : > { %v1135_v52 = vsel %vm1134_vm3, %v2135_v14, %v1131_v16 }
 0x731   : > { %v1137_v53 = vsel %vm1136_vm4, %v1135_v52, %v1109_v37  ;;  %vm1139_vm5 = vcmp.eq.s32.totalorder %v2069_v17, %v1135_v52 }
 0x732   : > { %v1140_v55 = vsel %vm1139_vm5, %v1138_v54, 0 }
 0x733   : > { %v1141_v56 = vsel %vm1033_vm2, %v1140_v55, 0 }
 0x734   : > { %v1143_v57 = vshrl.u32 %v1141_v56, 16  ;;  %v1142_v58 = vand.u32 65535, %v1141_v56  ;;  %v1241_v56 = vstv %s1240_s23 }
 0x735   : > { %vm1242_vm4 = vcmp.eq.s32.totalorder %v1241_v56, 1 }
 0x736   : > { %v1145_v59 = vcvt.s32.f32 %v1143_v57  ;;  %v1144_v60 = vcvt.s32.f32 %v1142_v58  ;;  %v1245_v57 = vstv %s1244_s24 }
 0x737   : > { %vm1246_vm5 = vcmp.eq.s32.totalorder %v1245_v57, 1 }
 0x738   : > { %1148 = vadd.xlane.f32.xlu1 %v1145_v59  ;;  %1146 = vadd.xlane.f32.xlu2 %v1144_v60 }
 0x7ab   : > { %v1149_v61 = vpop.xlane.xlu1 %1148  ;;  %v1147_v62 = vpop.xlane.xlu2 %1146 }
 0x7ac   : > { %v1151_v63 = vcvt.f32.s32 %v1149_v61  ;;  %v1150_v3 = vcvt.f32.s32 %v1147_v62 }
 0x7ae   : > { %v1152_v2 = vshll.u32 %v1151_v63, 16 }
 0x7b0   : > { %v1153_v4 = vadd.s32 %v1152_v2, %v1150_v3 }
 0x7b2   : > { %v1159_v5 = vsel %vm1158_vm7, %v1153_v4, 0  ;;  %vm1248_vm7 = vcmp.eq.s32.totalorder %v2069_v17, 1 }
 0x7b3   : > { %v1163_v6 = vsel %vm1162_vm8, %v2135_v14, %v1159_v5 }
 0x7b4   : > { %v1165_v7 = vsel %vm1164_vm9, %v1163_v6, %v1137_v53  ;;  %vm1167_vm10 = vcmp.eq.s32.totalorder %v2069_v17, %v1163_v6 }
 0x7b5   : > { %v1168_v9 = vsel %vm1167_vm10, %v1166_v8, 0  ;;  %vm1277_vm10 = vcmask 57344  }
 0x7b6   : > { %v1169_v10 = vsel %vm1033_vm2, %v1168_v9, 0 }
 0x7b7   : > { %v1171_v11 = vshrl.u32 %v1169_v10, 16  ;;  %v1170_v12 = vand.u32 65535, %v1169_v10  ;;  %v1269_v10 = vstv %s1268_s21 }
 0x7b9   : > { %v1173_v13 = vcvt.s32.f32 %v1171_v11  ;;  %v1172_v15 = vcvt.s32.f32 %v1170_v12  ;;  %v1273_v11 = vstv %s1272_s3 }
 0x7ba   : > { %vm1274_vm9 = vcmp.eq.s32.totalorder %v1273_v11, 1 }
 0x7bb   : > { %1176 = vadd.xlane.f32.xlu0 %v1173_v13  ;;  %1174 = vadd.xlane.f32.xlu1 %v1172_v15 }
 0x82e   : > { %v1177_v18 = vpop.xlane.xlu0 %1176  ;;  %v1175_v19 = vpop.xlane.xlu1 %1174 }
 0x82f   : > { %v1179_v20 = vcvt.f32.s32 %v1177_v18  ;;  %v1178_v26 = vcvt.f32.s32 %v1175_v19 }
 0x831   : > { %v1180_v25 = vshll.u32 %v1179_v20, 16 }
 0x833   : > { %v1181_v27 = vadd.s32 %v1180_v25, %v1178_v26 }
 0x835   : > { %v1187_v28 = vsel %vm1186_vm11, %v1181_v27, 0 }
 0x836   : > { %v1191_v29 = vsel %vm1190_vm12, %v2135_v14, %v1187_v28 }
 0x837   : > { %v1193_v30 = vsel %vm1192_vm13, %v1191_v29, %v1165_v7  ;;  %vm1195_vm14 = vcmp.eq.s32.totalorder %v2069_v17, %v1191_v29 }
 0x838   : > { %v1196_v32 = vsel %vm1195_vm14, %v1194_v31, 0 }
 0x839   : > { %v1197_v33 = vsel %vm1033_vm2, %v1196_v32, 0 }
 0x83a   : > { %v1199_v34 = vshrl.u32 %v1197_v33, 16  ;;  %v1198_v35 = vand.u32 65535, %v1197_v33 }
 0x83c   : > { %v1201_v21 = vcvt.s32.f32 %v1199_v34  ;;  %v1200_v36 = vcvt.s32.f32 %v1198_v35 }
 0x83e   : > { %1204 = vadd.xlane.f32.xlu2 %v1201_v21  ;;  %1202 = vadd.xlane.f32.xlu0 %v1200_v36 }
 0x8b1   : > { %v1205_v37 = vpop.xlane.xlu2 %1204  ;;  %v1203_v38 = vpop.xlane.xlu0 %1202 }
 0x8b2   : > { %v1207_v39 = vcvt.f32.s32 %v1205_v37  ;;  %v1206_v24 = vcvt.f32.s32 %v1203_v38 }
 0x8b4   : > { %v1208_v42 = vshll.u32 %v1207_v39, 16 }
 0x8b6   : > { %v1209_v43 = vadd.s32 %v1208_v42, %v1206_v24 }
 0x8b8   : > { %v1215_v44 = vsel %vm1214_vm15, %v1209_v43, 0 }
 0x8b9   : > { %v1219_v45 = vsel %vm1218_vm0, %v2135_v14, %v1215_v44 }
 0x8ba   : > { %v1221_v46 = vsel %vm1220_vm1, %v1219_v45, %v1193_v30  ;;  %vm1223_vm3 = vcmp.eq.s32.totalorder %v2069_v17, %v1219_v45 }
 0x8bb   : > { %v1224_v48 = vsel %vm1223_vm3, %v1222_v47, 0 }
 0x8bc   : > { %v1225_v49 = vsel %vm1033_vm2, %v1224_v48, 0 }
 0x8bd   : > { %v1227_v50 = vshrl.u32 %v1225_v49, 16  ;;  %v1226_v51 = vand.u32 65535, %v1225_v49 }
 0x8bf   : > { %v1229_v16 = vcvt.s32.f32 %v1227_v50  ;;  %v1228_v52 = vcvt.s32.f32 %v1226_v51 }
 0x8c1   : > { %1232 = vadd.xlane.f32.xlu1 %v1229_v16  ;;  %1230 = vadd.xlane.f32.xlu2 %v1228_v52 }
 0x934   : > { %v1233_v53 = vpop.xlane.xlu1 %1232  ;;  %v1231_v54 = vpop.xlane.xlu2 %1230 }
 0x935   : > { %v1235_v55 = vcvt.f32.s32 %v1233_v53  ;;  %v1234_v59 = vcvt.f32.s32 %v1231_v54 }
 0x937   : > { %v1236_v58 = vshll.u32 %v1235_v55, 16 }
 0x939   : > { %v1237_v60 = vadd.s32 %v1236_v58, %v1234_v59 }
 0x93b   : > { %v1243_v61 = vsel %vm1242_vm4, %v1237_v60, 0 }
 0x93c   : > { %v1247_v62 = vsel %vm1246_vm5, %v2135_v14, %v1243_v61 }
 0x93d   : > { %v1249_v63 = vsel %vm1248_vm7, %v1247_v62, %v1221_v46  ;;  %vm1251_vm8 = vcmp.eq.s32.totalorder %v2069_v17, %v1247_v62 }
 0x93e   : > { %v1252_v1 = vsel %vm1251_vm8, %v1250_v0, 0 }
 0x93f   : > { %v1253_v2 = vsel %vm1033_vm2, %v1252_v1, 0  ;;  %vm1270_vm2 = vcmp.eq.s32.totalorder %v1269_v10, 1 }
 0x940   : > { %v1255_v3 = vshrl.u32 %v1253_v2, 16  ;;  %v1254_v4 = vand.u32 65535, %v1253_v2 }
 0x942   : > { %v1257_v5 = vcvt.s32.f32 %v1255_v3  ;;  %v1256_v6 = vcvt.s32.f32 %v1254_v4 }
 0x944   : > { %1260 = vadd.xlane.f32.xlu0 %v1257_v5  ;;  %1258 = vadd.xlane.f32.xlu1 %v1256_v6 }
 0x9b7   : > { %v1261_v7 = vpop.xlane.xlu0 %1260  ;;  %v1259_v8 = vpop.xlane.xlu1 %1258 }
 0x9b8   : > { %v1263_v9 = vcvt.f32.s32 %v1261_v7  ;;  %v1262_v13 = vcvt.f32.s32 %v1259_v8 }
 0x9ba   : > { %v1264_v12 = vshll.u32 %v1263_v9, 16 }
 0x9bc   : > { %v1265_v15 = vadd.s32 %v1264_v12, %v1262_v13 }
 0x9be   : > { %v1271_v18 = vsel %vm1270_vm2, %v1265_v15, 0 }
 0x9bf   : > { %v1275_v19 = vsel %vm1274_vm9, %v2135_v14, %v1271_v18 }
 0x9c0   : > { %v1276_v20 = vsel %vm1056_vm6, %v1275_v19, %v1249_v63 }
 0x9c1   : > { %1278 = vst.msk [vmem:[%s314_s12] sm:$0x1] %vm1277_vm10, %v1276_v20 }
 0x9c2   : > { %1846 = shalt.err (!%p1843_p8)
}
 0x9c3   : > { %1642 = dma.vmem_to_hbm [thread:$0]  (%p2015_p4), %s1291_s26, 16, %s1293_s22, %s1280_s18  }
 0x9c4 PF: > { %s1304_s15 = sand.u32 1, %s1879_s13   ;;  %p2236_p9 = scmp.ge.s32.totalorder %s1891_s1, 2 }
 0x9c5   : > { %s1305_s24 = scalar_lea.sflag [#allocation9], %s1304_s15 }
 0x9c6   : > { %p1656_p10 = pnand %p2236_p9, %p2019_p6 }
 0x9c8   : > { %p1657_p11 = pneg %p1656_p10 }
 0x9ca   : > { %1874 = dma.done.wait (%p1657_p11), %s1305_s24, 16  }
 0x9cb   : > { %1876 = vsyncadd (%p1657_p11), %s1305_s24, 4294967280  ;;  %p35_p13 = scmp.ge.s32.totalorder %s1993_s30, 4   ;;  %s2237_s13 = smov %s1883_s0 }
 0x9cc   : > { %s2238_s0 = smov %s1887_s14  ;;  %s2239_s14 = smov %s2004_s11 }
 0x9cd   : > { %s2240_s1 = smov %s1993_s30  ;;  %37 = sbr.rel (!%p35_p13) target bundleno = 14 (0xe), region = 97 }
 0x9d2   :  { %1310 = vsyncpa [#allocation8], 1 }
 0x9d3   :  { %1312 = vsyncpa [#allocation8 + $0x1], 1 }
 0x9d4   :  { %1313 = vsyncpa [#allocation11], 1 }
 0x9d5   :  { %1314 = vsyncpa [#allocation9], 1 }
 0x9d6   :  { %1316 = vsyncpa [#allocation9 + $0x1], 1 }

</bundles_post_ra>
